<compile_context>
chip_gen: v5e
topology: v5e:2x2
jax: 0.10.0
libtpu: 0.0.40
codegen_flags: <defaults>
</compile_context>

<pallas_src>
import jax
import jax.numpy as jnp
from jax.experimental import pallas as pl
from jax.experimental.pallas import tpu as pltpu  # noqa: F401  (not needed at this size)

# Model hyperparameters (consistent with the module defaults: heads=8, ff_mult=4)
BATCH = 2
SEQ = 8
EMB = 32
HEADS = 8
FF_MULT = 4
EPS = 1e-5          # nn.LayerNorm default
NEG_INF = -1e30     # same constant as mask_logits in the PyTorch code

HE = HEADS * EMB            # 256
FH = FF_MULT * EMB          # 128

# Column offsets inside the packed weight slabs (all multiples of 128 -> lane aligned)
OFF_QKV = 0                 # wa[:, 0:768]     (E, 3*H*E)
OFF_W1 = 3 * HE             # wa[:, 768:896]   (E, FH)
OFF_ST = OFF_W1 + FH        # wa[0:H, 896:1152]  (H, H*E) head-expand 0/1 matrix
WA_COLS = OFF_ST + HE       # 1152
OFF_WU = 0                  # wb[:, 0:32]      (H*E, E)
OFF_W2 = 128                # wb[0:FH, 128:160]  (FH, E)
OFF_S = 256                 # wb[:, 256:264]   (H*E, H) head-pool 0/1 matrix
WB_COLS = 384


def _layer_norm(y, gamma, beta):
    mu = jnp.mean(y, axis=-1, keepdims=True)
    var = jnp.mean((y - mu) ** 2, axis=-1, keepdims=True)
    return (y - mu) * jax.lax.rsqrt(var + EPS) * gamma + beta


def transformer_block_kernel(x_ref, valid_ref, wa_ref, wb_ref, vec_ref, o_ref):
    B, T, H, E = BATCH, SEQ, HEADS, EMB

    x = x_ref[...]                                            # (B*T, E) f32

    # ---- static, lane-aligned parameter slices -----------------------------
    wqkv = wa_ref[:, OFF_QKV:OFF_QKV + 3 * HE]                # (E, 3*H*E)
    w1 = wa_ref[:, OFF_W1:OFF_W1 + FH]                        # (E, FH)
    st = wa_ref[0:H, OFF_ST:OFF_ST + HE]                      # (H, H*E)  expand
    wu = wb_ref[:, OFF_WU:OFF_WU + E]                         # (H*E, E)
    w2 = wb_ref[0:FH, OFF_W2:OFF_W2 + E]                      # (FH, E)
    spool = wb_ref[:, OFF_S:OFF_S + H]                        # (H*E, H)  pool

    bu = vec_ref[0:1, 0:E]
    g1 = vec_ref[1:2, 0:E]
    be1 = vec_ref[2:3, 0:E]
    b1 = vec_ref[3:4, 0:FH]
    b2 = vec_ref[4:5, 0:E]
    g2 = vec_ref[5:6, 0:E]
    be2 = vec_ref[6:7, 0:E]

    # ---- fused QKV projection: one (B*T,E)@(E,3*H*E) matmul ----------------
    # (the 1/sqrt(E) score scale is already folded into the Q columns)
    qkv = jnp.dot(x, wqkv, preferred_element_type=jnp.float32)     # (B*T, 768)
    q = qkv[:, 0:HE].reshape(B, T, HE)                             # (B, Tq, H*E)
    k = qkv[:, HE:2 * HE].reshape(B, T, HE)                        # (B, Tk, H*E)
    v = qkv[:, 2 * HE:3 * HE].reshape(B, T, HE)                    # (B, Tk, H*E)

    # ---- attention scores, transpose-free -----------------------------------
    # prod[b,k,q,:] = k[b,k,:] * q[b,q,:]  (VPU broadcast-multiply, lane-dense)
    prod = k[:, :, None, :] * q[:, None, :, :]                     # (B,Tk,Tq,H*E)
    scores = jnp.dot(prod.reshape(B * T * T, HE), spool,
                     preferred_element_type=jnp.float32)           # (B*Tk*Tq, H)
    scores = scores.reshape(B, T, T, H)                            # (B, Tk, Tq, H)

    # exact mask_logits semantics: invalid (q,k) pairs become exactly -1e30
    logits = jnp.where(valid_ref[...] > 0.5, scores, NEG_INF)

    # softmax over the key axis (axis=1, a major dim -> tile-wise VPU reduce)
    mx = jnp.max(logits, axis=1, keepdims=True)
    p = jnp.exp(logits - mx)
    p = p * pl.reciprocal(jnp.sum(p, axis=1, keepdims=True), approx=True)

    # ---- context: expand per-head prob across its E lanes, mul by V, sum over k
    pexp = jnp.dot(p.reshape(B * T * T, H), st,
                   preferred_element_type=jnp.float32)             # (B*Tk*Tq, H*E)
    pexp = pexp.reshape(B, T, T, HE)                               # (B, Tk, Tq, H*E)
    ctx = jnp.sum(pexp * v[:, :, None, :], axis=1)                 # (B, Tq, H*E)
    ctx = ctx.reshape(B * T, HE)                                   # (B*T, H*E) lane-dense

    # ---- unify heads + residual + LayerNorm1 (dropout p=0 -> identity) ------
    attended = jnp.dot(ctx, wu, preferred_element_type=jnp.float32) + bu
    y1 = _layer_norm(attended + x, g1, be1)

    # ---- feed-forward: Linear -> ReLU -> Linear ------------------------------
    hmid = jnp.maximum(jnp.dot(y1, w1, preferred_element_type=jnp.float32) + b1, 0.0)
    ff = jnp.dot(hmid, w2, preferred_element_type=jnp.float32) + b2

    # ---- residual + LayerNorm2 ----------------------------------------------
    o_ref[...] = _layer_norm(ff + y1, g2, be2).astype(o_ref.dtype)


def pack_params(params):
    """One-time (init-time) packing of all parameters into 3 DMA-friendly slabs."""
    e, h = EMB, HEADS
    scale2 = float(e) ** (-0.5)          # == (e**-0.25 on q) * (e**-0.25 on k)

    wqkv = jnp.concatenate(
        [params["wq"] * scale2, params["wk"], params["wv"]], axis=1)     # (E, 3*H*E)
    st = jnp.repeat(jnp.eye(h, dtype=jnp.float32), e, axis=1)            # (H, H*E)
    spool = st.T                                                         # (H*E, H)

    wa = jnp.zeros((e, WA_COLS), jnp.float32)
    wa = wa.at[:, OFF_QKV:OFF_QKV + 3 * HE].set(wqkv)
    wa = wa.at[:, OFF_W1:OFF_W1 + FH].set(params["w1"])
    wa = wa.at[0:h, OFF_ST:OFF_ST + HE].set(st)

    wb = jnp.zeros((HE, WB_COLS), jnp.float32)
    wb = wb.at[:, OFF_WU:OFF_WU + e].set(params["wu"])
    wb = wb.at[0:FH, OFF_W2:OFF_W2 + e].set(params["w2"])
    wb = wb.at[:, OFF_S:OFF_S + h].set(spool)

    vec = jnp.zeros((8, 128), jnp.float32)
    vec = vec.at[0, 0:e].set(params["bu"][0])
    vec = vec.at[1, 0:e].set(params["g1"][0])
    vec = vec.at[2, 0:e].set(params["be1"][0])
    vec = vec.at[3, 0:FH].set(params["b1"][0])
    vec = vec.at[4, 0:e].set(params["b2"][0])
    vec = vec.at[5, 0:e].set(params["g2"][0])
    vec = vec.at[6, 0:e].set(params["be2"][0])

    return {"wa": wa, "wb": wb, "vec": vec}


@jax.jit
def transformer_block(x, mask_idx, packed):
    b, t, e = x.shape
    x2 = x.reshape(b * t, e)
    m = mask_idx.reshape(b, t).astype(jnp.float32)
    valid = m[:, :, None] * m[:, None, :]                               # (B, Tk, Tq)
    valid = jnp.broadcast_to(valid[..., None], (b, t, t, HEADS))        # (B, Tk, Tq, H)

    out = pl.pallas_call(
        transformer_block_kernel,
        out_shape=jax.ShapeDtypeStruct((b * t, e), jnp.float32),
    )(x2, valid, packed["wa"], packed["wb"], packed["vec"])
    return out.reshape(b, t, e)


def transformer_block_ref(x, mask_idx, params):
    """Pure-JAX reference mirroring the PyTorch forward exactly."""
    b, t, e = x.shape
    h = HEADS
    scale = float(e) ** (-0.25)

    q = (x @ params["wq"]).reshape(b, t, h, e).transpose(0, 2, 1, 3).reshape(b * h, t, e)
    k = (x @ params["wk"]).reshape(b, t, h, e).transpose(0, 2, 1, 3).reshape(b * h, t, e)
    v = (x @ params["wv"]).reshape(b, t, h, e).transpose(0, 2, 1, 3).reshape(b * h, t, e)
    q = q * scale
    k = k * scale
    dot = jnp.einsum("bqd,bkd->bqk", q, k)
    m = jnp.repeat(mask_idx[:, None, :, :], h, axis=1).reshape(b * h, t, 1)
    mm = m @ jnp.swapaxes(m, 1, 2)
    logits = dot * mm + (1.0 - mm) * NEG_INF
    p = jax.nn.softmax(logits, axis=-1)
    out = (p @ v).reshape(b, h, t, e).transpose(0, 2, 1, 3).reshape(b, t, h * e)
    attended = out @ params["wu"] + params["bu"][0]

    def ln(y, g, be):
        mu = jnp.mean(y, axis=-1, keepdims=True)
        var = jnp.mean((y - mu) ** 2, axis=-1, keepdims=True)
        return (y - mu) / jnp.sqrt(var + EPS) * g[0] + be[0]

    y1 = ln(attended + x, params["g1"], params["be1"])
    ff = jnp.maximum(y1 @ params["w1"] + params["b1"][0], 0.0) @ params["w2"] + params["b2"][0]
    return ln(ff + y1, params["g2"], params["be2"])


def make_params(key):
    ks = jax.random.split(key, 8)
    he = HEADS * EMB
    fh = FF_MULT * EMB
    s = 0.1
    return {
        # q/k/v projection weights, stored as (E, H*E)  (== PyTorch weight.T)
        "wq": jax.random.normal(ks[0], (EMB, he), jnp.float32) * s,
        "wk": jax.random.normal(ks[1], (EMB, he), jnp.float32) * s,
        "wv": jax.random.normal(ks[2], (EMB, he), jnp.float32) * s,
        # unifyheads: (H*E, E) + bias
        "wu": jax.random.normal(ks[3], (he, EMB), jnp.float32) * s,
        "bu": jax.random.normal(ks[4], (1, EMB), jnp.float32) * s,
        # LayerNorm 1
        "g1": jnp.ones((1, EMB), jnp.float32),
        "be1": jnp.zeros((1, EMB), jnp.float32),
        # FFN
        "w1": jax.random.normal(ks[5], (EMB, fh), jnp.float32) * s,
        "b1": jnp.zeros((1, fh), jnp.float32),
        "w2": jax.random.normal(ks[6], (fh, EMB), jnp.float32) * s,
        "b2": jnp.zeros((1, EMB), jnp.float32),
        # LayerNorm 2
        "g2": jnp.ones((1, EMB), jnp.float32),
        "be2": jnp.zeros((1, EMB), jnp.float32),
    }


if __name__ == "__main__":
    key = jax.random.PRNGKey(0)
    kx, kp = jax.random.split(key)

    x = jax.random.normal(kx, (BATCH, SEQ, EMB), jnp.float32)
    # binary padding mask, shape (B, T, 1): first `length` tokens valid
    lengths = jnp.array([SEQ, 5], dtype=jnp.int32)
    mask_idx = (jnp.arange(SEQ)[None, :] < lengths[:, None]).astype(jnp.float32)[..., None]

    params = make_params(kp)
    packed = pack_params(params)          # one-time packing, outside the hot path

    out = transformer_block(x, mask_idx, packed)
    out = jax.block_until_ready(out)

    ref = transformer_block_ref(x, mask_idx, params)

    assert out.shape == (BATCH, SEQ, EMB)
    assert bool(jnp.all(jnp.isfinite(out)))
    assert jnp.allclose(out, ref, rtol=2e-2, atol=2e-2), float(jnp.max(jnp.abs(out - ref)))

    print("KERNEL_OK")
</pallas_src>

<mosaic_0001>
module attributes {stable_mosaic.version = 11 : i64} {
  func.func @transformer_block_kernel(%arg0: memref<16x32xf32, #tpu.memory_space<vmem>>, %arg1: memref<2x8x8x8xf32, #tpu.memory_space<vmem>>, %arg2: memref<32x1152xf32, #tpu.memory_space<vmem>>, %arg3: memref<256x384xf32, #tpu.memory_space<vmem>>, %arg4: memref<8x128xf32, #tpu.memory_space<vmem>>, %arg5: memref<16x32xf32, #tpu.memory_space<vmem>>) attributes {dimension_semantics = [], scalar_prefetch = 0 : i64, scratch_operands = 0 : i64, tpu.core_type = #tpu.core_type<tc>} {
    %c0 = arith.constant 0 : index
    %c0_0 = arith.constant 0 : index
    %0 = vector.load %arg0[%c0, %c0_0] : memref<16x32xf32, #tpu.memory_space<vmem>>, vector<16x32xf32>
    %c0_1 = arith.constant 0 : index
    %c0_2 = arith.constant 0 : index
    %1 = vector.load %arg2[%c0_1, %c0_2] : memref<32x1152xf32, #tpu.memory_space<vmem>>, vector<32x768xf32>
    %c0_3 = arith.constant 0 : index
    %c768 = arith.constant 768 : index
    %2 = vector.load %arg2[%c0_3, %c768] : memref<32x1152xf32, #tpu.memory_space<vmem>>, vector<32x128xf32>
    %c0_4 = arith.constant 0 : index
    %c896 = arith.constant 896 : index
    %3 = vector.load %arg2[%c0_4, %c896] : memref<32x1152xf32, #tpu.memory_space<vmem>>, vector<8x256xf32>
    %c0_5 = arith.constant 0 : index
    %c0_6 = arith.constant 0 : index
    %4 = vector.load %arg3[%c0_5, %c0_6] : memref<256x384xf32, #tpu.memory_space<vmem>>, vector<256x32xf32>
    %c0_7 = arith.constant 0 : index
    %c128 = arith.constant 128 : index
    %5 = vector.load %arg3[%c0_7, %c128] : memref<256x384xf32, #tpu.memory_space<vmem>>, vector<128x32xf32>
    %c0_8 = arith.constant 0 : index
    %c256 = arith.constant 256 : index
    %6 = vector.load %arg3[%c0_8, %c256] : memref<256x384xf32, #tpu.memory_space<vmem>>, vector<256x8xf32>
    %c0_9 = arith.constant 0 : index
    %c0_10 = arith.constant 0 : index
    %7 = vector.load %arg4[%c0_9, %c0_10] : memref<8x128xf32, #tpu.memory_space<vmem>>, vector<1x32xf32>
    %c1 = arith.constant 1 : index
    %c0_11 = arith.constant 0 : index
    %8 = vector.load %arg4[%c1, %c0_11] : memref<8x128xf32, #tpu.memory_space<vmem>>, vector<1x32xf32>
    %c2 = arith.constant 2 : index
    %c0_12 = arith.constant 0 : index
    %9 = vector.load %arg4[%c2, %c0_12] : memref<8x128xf32, #tpu.memory_space<vmem>>, vector<1x32xf32>
    %c3 = arith.constant 3 : index
    %c0_13 = arith.constant 0 : index
    %10 = vector.load %arg4[%c3, %c0_13] : memref<8x128xf32, #tpu.memory_space<vmem>>, vector<1x128xf32>
    %c4 = arith.constant 4 : index
    %c0_14 = arith.constant 0 : index
    %11 = vector.load %arg4[%c4, %c0_14] : memref<8x128xf32, #tpu.memory_space<vmem>>, vector<1x32xf32>
    %c5 = arith.constant 5 : index
    %c0_15 = arith.constant 0 : index
    %12 = vector.load %arg4[%c5, %c0_15] : memref<8x128xf32, #tpu.memory_space<vmem>>, vector<1x32xf32>
    %c6 = arith.constant 6 : index
    %c0_16 = arith.constant 0 : index
    %13 = vector.load %arg4[%c6, %c0_16] : memref<8x128xf32, #tpu.memory_space<vmem>>, vector<1x32xf32>
    %cst = arith.constant dense<0.000000e+00> : vector<16x768xf32>
    %14 = tpu.matmul %0, %1, %cst {dimension_numbers = #tpu.dot_dimension_numbers<[1], [0], [0], [1], [0, 0, 1, 1], [], []>} : vector<16x32xf32>, vector<32x768xf32>, vector<16x768xf32> -> vector<16x768xf32>
    %15 = vector.extract_strided_slice %14 {offsets = [0, 0], sizes = [16, 256], strides = [1, 1]} : vector<16x768xf32> to vector<16x256xf32>
    %16 = vector.shape_cast %15 : vector<16x256xf32> to vector<2x8x256xf32>
    %17 = vector.extract_strided_slice %14 {offsets = [0, 256], sizes = [16, 256], strides = [1, 1]} : vector<16x768xf32> to vector<16x256xf32>
    %18 = vector.shape_cast %17 : vector<16x256xf32> to vector<2x8x256xf32>
    %19 = vector.extract_strided_slice %14 {offsets = [0, 512], sizes = [16, 256], strides = [1, 1]} : vector<16x768xf32> to vector<16x256xf32>
    %20 = vector.shape_cast %19 : vector<16x256xf32> to vector<2x8x256xf32>
    %21 = vector.shape_cast %18 : vector<2x8x256xf32> to vector<2x8x1x256xf32>
    %22 = vector.shape_cast %16 : vector<2x8x256xf32> to vector<2x1x8x256xf32>
    %23 = vector.broadcast %21 : vector<2x8x1x256xf32> to vector<2x8x8x256xf32>
    %24 = vector.broadcast %22 : vector<2x1x8x256xf32> to vector<2x8x8x256xf32>
    %25 = arith.mulf %23, %24 : vector<2x8x8x256xf32>
    %26 = vector.shape_cast %25 : vector<2x8x8x256xf32> to vector<128x256xf32>
    %cst_17 = arith.constant dense<0.000000e+00> : vector<128x8xf32>
    %27 = tpu.matmul %26, %6, %cst_17 {dimension_numbers = #tpu.dot_dimension_numbers<[1], [0], [0], [1], [0, 0, 1, 1], [], []>} : vector<128x256xf32>, vector<256x8xf32>, vector<128x8xf32> -> vector<128x8xf32>
    %28 = vector.shape_cast %27 : vector<128x8xf32> to vector<2x8x8x8xf32>
    %c0_18 = arith.constant 0 : index
    %c0_19 = arith.constant 0 : index
    %c0_20 = arith.constant 0 : index
    %c0_21 = arith.constant 0 : index
    %29 = vector.load %arg1[%c0_18, %c0_19, %c0_20, %c0_21] : memref<2x8x8x8xf32, #tpu.memory_space<vmem>>, vector<2x8x8x8xf32>
    %cst_22 = arith.constant 5.000000e-01 : f32
    %30 = vector.broadcast %cst_22 : f32 to vector<2x8x8x8xf32>
    %31 = arith.cmpf ogt, %29, %30 : vector<2x8x8x8xf32>
    %cst_23 = arith.constant -1.000000e+30 : f32
    %32 = vector.broadcast %cst_23 : f32 to vector<2x8x8x8xf32>
    %33 = arith.select %31, %28, %32 : vector<2x8x8x8xi1>, vector<2x8x8x8xf32>
    %cst_24 = arith.constant dense<0xFF800000> : vector<2x8x8xf32>
    %34 = vector.multi_reduction <maximumf>, %33, %cst_24 [1] : vector<2x8x8x8xf32> to vector<2x8x8xf32>
    %35 = vector.shape_cast %34 : vector<2x8x8xf32> to vector<2x1x8x8xf32>
    %36 = vector.broadcast %35 : vector<2x1x8x8xf32> to vector<2x8x8x8xf32>
    %37 = arith.subf %33, %36 : vector<2x8x8x8xf32>
    %38 = math.exp %37 : vector<2x8x8x8xf32>
    %cst_25 = arith.constant dense<0.000000e+00> : vector<2x8x8xf32>
    %39 = vector.multi_reduction <add>, %38, %cst_25 [1] : vector<2x8x8x8xf32> to vector<2x8x8xf32>
    %40 = vector.shape_cast %39 : vector<2x8x8xf32> to vector<2x1x8x8xf32>
    %41 = tpu.reciprocal %40 {approx = true} : vector<2x1x8x8xf32> -> vector<2x1x8x8xf32>
    %42 = vector.broadcast %41 : vector<2x1x8x8xf32> to vector<2x8x8x8xf32>
    %43 = arith.mulf %38, %42 : vector<2x8x8x8xf32>
    %44 = vector.shape_cast %43 : vector<2x8x8x8xf32> to vector<128x8xf32>
    %cst_26 = arith.constant dense<0.000000e+00> : vector<128x256xf32>
    %45 = tpu.matmul %44, %3, %cst_26 {dimension_numbers = #tpu.dot_dimension_numbers<[1], [0], [0], [1], [0, 0, 1, 1], [], []>} : vector<128x8xf32>, vector<8x256xf32>, vector<128x256xf32> -> vector<128x256xf32>
    %46 = vector.shape_cast %45 : vector<128x256xf32> to vector<2x8x8x256xf32>
    %47 = vector.shape_cast %20 : vector<2x8x256xf32> to vector<2x8x1x256xf32>
    %48 = vector.broadcast %47 : vector<2x8x1x256xf32> to vector<2x8x8x256xf32>
    %49 = arith.mulf %46, %48 : vector<2x8x8x256xf32>
    %cst_27 = arith.constant dense<0.000000e+00> : vector<2x8x256xf32>
    %50 = vector.multi_reduction <add>, %49, %cst_27 [1] : vector<2x8x8x256xf32> to vector<2x8x256xf32>
    %51 = vector.shape_cast %50 : vector<2x8x256xf32> to vector<16x256xf32>
    %cst_28 = arith.constant dense<0.000000e+00> : vector<16x32xf32>
    %52 = tpu.matmul %51, %4, %cst_28 {dimension_numbers = #tpu.dot_dimension_numbers<[1], [0], [0], [1], [0, 0, 1, 1], [], []>} : vector<16x256xf32>, vector<256x32xf32>, vector<16x32xf32> -> vector<16x32xf32>
    %53 = vector.broadcast %7 : vector<1x32xf32> to vector<16x32xf32>
    %54 = arith.addf %52, %53 : vector<16x32xf32>
    %55 = arith.addf %54, %0 : vector<16x32xf32>
    %cst_29 = arith.constant dense<0.000000e+00> : vector<16xf32>
    %56 = vector.multi_reduction <add>, %55, %cst_29 [1] : vector<16x32xf32> to vector<16xf32>
    %57 = vector.shape_cast %56 : vector<16xf32> to vector<16x1xf32>
    %cst_30 = arith.constant 3.200000e+01 : f32
    %58 = vector.broadcast %cst_30 : f32 to vector<16x1xf32>
    %59 = arith.divf %57, %58 : vector<16x1xf32>
    %60 = vector.broadcast %59 : vector<16x1xf32> to vector<16x32xf32>
    %61 = arith.subf %55, %60 : vector<16x32xf32>
    %62 = arith.mulf %61, %61 : vector<16x32xf32>
    %cst_31 = arith.constant dense<0.000000e+00> : vector<16xf32>
    %63 = vector.multi_reduction <add>, %62, %cst_31 [1] : vector<16x32xf32> to vector<16xf32>
    %64 = vector.shape_cast %63 : vector<16xf32> to vector<16x1xf32>
    %cst_32 = arith.constant 3.200000e+01 : f32
    %65 = vector.broadcast %cst_32 : f32 to vector<16x1xf32>
    %66 = arith.divf %64, %65 : vector<16x1xf32>
    %67 = vector.broadcast %59 : vector<16x1xf32> to vector<16x32xf32>
    %68 = arith.subf %55, %67 : vector<16x32xf32>
    %cst_33 = arith.constant 9.99999974E-6 : f32
    %69 = vector.broadcast %cst_33 : f32 to vector<16x1xf32>
    %70 = arith.addf %66, %69 : vector<16x1xf32>
    %71 = math.rsqrt %70 : vector<16x1xf32>
    %72 = vector.broadcast %71 : vector<16x1xf32> to vector<16x32xf32>
    %73 = arith.mulf %68, %72 : vector<16x32xf32>
    %74 = vector.broadcast %8 : vector<1x32xf32> to vector<16x32xf32>
    %75 = arith.mulf %73, %74 : vector<16x32xf32>
    %76 = vector.broadcast %9 : vector<1x32xf32> to vector<16x32xf32>
    %77 = arith.addf %75, %76 : vector<16x32xf32>
    %cst_34 = arith.constant dense<0.000000e+00> : vector<16x128xf32>
    %78 = tpu.matmul %77, %2, %cst_34 {dimension_numbers = #tpu.dot_dimension_numbers<[1], [0], [0], [1], [0, 0, 1, 1], [], []>} : vector<16x32xf32>, vector<32x128xf32>, vector<16x128xf32> -> vector<16x128xf32>
    %79 = vector.broadcast %10 : vector<1x128xf32> to vector<16x128xf32>
    %80 = arith.addf %78, %79 : vector<16x128xf32>
    %cst_35 = arith.constant 0.000000e+00 : f32
    %81 = vector.broadcast %cst_35 : f32 to vector<16x128xf32>
    %82 = arith.maximumf %80, %81 : vector<16x128xf32>
    %cst_36 = arith.constant dense<0.000000e+00> : vector<16x32xf32>
    %83 = tpu.matmul %82, %5, %cst_36 {dimension_numbers = #tpu.dot_dimension_numbers<[1], [0], [0], [1], [0, 0, 1, 1], [], []>} : vector<16x128xf32>, vector<128x32xf32>, vector<16x32xf32> -> vector<16x32xf32>
    %84 = vector.broadcast %11 : vector<1x32xf32> to vector<16x32xf32>
    %85 = arith.addf %83, %84 : vector<16x32xf32>
    %86 = arith.addf %85, %77 : vector<16x32xf32>
    %cst_37 = arith.constant dense<0.000000e+00> : vector<16xf32>
    %87 = vector.multi_reduction <add>, %86, %cst_37 [1] : vector<16x32xf32> to vector<16xf32>
    %88 = vector.shape_cast %87 : vector<16xf32> to vector<16x1xf32>
    %cst_38 = arith.constant 3.200000e+01 : f32
    %89 = vector.broadcast %cst_38 : f32 to vector<16x1xf32>
    %90 = arith.divf %88, %89 : vector<16x1xf32>
    %91 = vector.broadcast %90 : vector<16x1xf32> to vector<16x32xf32>
    %92 = arith.subf %86, %91 : vector<16x32xf32>
    %93 = arith.mulf %92, %92 : vector<16x32xf32>
    %cst_39 = arith.constant dense<0.000000e+00> : vector<16xf32>
    %94 = vector.multi_reduction <add>, %93, %cst_39 [1] : vector<16x32xf32> to vector<16xf32>
    %95 = vector.shape_cast %94 : vector<16xf32> to vector<16x1xf32>
    %cst_40 = arith.constant 3.200000e+01 : f32
    %96 = vector.broadcast %cst_40 : f32 to vector<16x1xf32>
    %97 = arith.divf %95, %96 : vector<16x1xf32>
    %98 = vector.broadcast %90 : vector<16x1xf32> to vector<16x32xf32>
    %99 = arith.subf %86, %98 : vector<16x32xf32>
    %cst_41 = arith.constant 9.99999974E-6 : f32
    %100 = vector.broadcast %cst_41 : f32 to vector<16x1xf32>
    %101 = arith.addf %97, %100 : vector<16x1xf32>
    %102 = math.rsqrt %101 : vector<16x1xf32>
    %103 = vector.broadcast %102 : vector<16x1xf32> to vector<16x32xf32>
    %104 = arith.mulf %99, %103 : vector<16x32xf32>
    %105 = vector.broadcast %12 : vector<1x32xf32> to vector<16x32xf32>
    %106 = arith.mulf %104, %105 : vector<16x32xf32>
    %107 = vector.broadcast %13 : vector<1x32xf32> to vector<16x32xf32>
    %108 = arith.addf %106, %107 : vector<16x32xf32>
    %c0_42 = arith.constant 0 : index
    %c0_43 = arith.constant 0 : index
    %109 = vector.load %arg5[%c0_42, %c0_43] : memref<16x32xf32, #tpu.memory_space<vmem>>, vector<16x32xf32>
    tpu.vector_store %arg5[%c0_42, %c0_43], %108 {strides = array<i32>} : memref<16x32xf32, #tpu.memory_space<vmem>>, vector<16x32xf32>,
    return
  }
}

</mosaic_0001>

<bundles_post_ra>
// kernel: transformer_block.1
= control target key start
LH: loop header
LB: loop body
LE: loop exit
PB: predicated region body
PF: predicated region fallthrough
CT: control target
= control target key end

     0   :  { %10 = vsyncpa [#allocation3], 0  ;;  %s1939_s0 = inlined_call_operand.vmem [shape: f32[16,32], index: 0, kind: input, shape index: {}]   ;;  %s1940_s1 = inlined_call_operand.vmem [shape: f32[2,8,8,8], index: 1, kind: input, shape index: {}]   ;;  %s1941_s2 = inlined_call_operand.hbm [shape: f32[32,1152], index: 2, kind: input, shape index: {}]   ;;  %s1942_s3 = inlined_call_operand.hbm [shape: f32[256,384], index: 3, kind: input, shape index: {}]   ;;  %s1943_s4 = inlined_call_operand.vmem [shape: f32[8,128], index: 4, kind: input, shape index: {}]   ;;  %s1944_s5 = inlined_call_operand.hbm [shape: f32[16,32], index: 5, kind: output, shape index: {}]  }
   0x1   :  { %11 = vsyncpa [#allocation6], 0 }
   0x2   :  { %12 = vsyncpa [#allocation4], 0  ;;  %s21_s20 = sshll.u32 %s1941_s2, 4  ;;  %s1525_s21 = smov [#allocation2]   ;;  %s22_s20 = int_to_ptr.hbm [resolvable:$true] %s21_s20 }
   0x3   :  { %s23_s22 = sshll.u32 %s1525_s21, 4  ;;  %s34_s25 = sshll.u32 %s1942_s3, 4  ;;  %s24_s22 = int_to_ptr.vmem [resolvable:$true] %s23_s22  ;;  %s35_s25 = int_to_ptr.hbm [resolvable:$true] %s34_s25 }
   0x4   :  { %s1526_s26 = smov 1152   ;;  %s1527_s27 = smov 72  }
   0x5   :  { %29 = dma.hbm_to_vmem [thread:$0]  %s22_s20, 4608, %s24_s22, [#allocation3], %s1526_s26, %s1526_s26, %s1527_s27  }
   0x6   :  { %s1528_s28 = smov [#allocation5]   ;;  %s1529_s30 = smov 384  }
   0x7   :  { %s36_s29 = sshll.u32 %s1528_s28, 4  ;;  %s1530_s6 = smov 24   ;;  %s37_s29 = int_to_ptr.vmem [resolvable:$true] %s36_s29 }
   0x8   :  { %42 = dma.hbm_to_vmem [thread:$0]  %s35_s25, 12288, %s37_s29, [#allocation6], %s1529_s30, %s1529_s30, %s1530_s6  }
   0x9   :  { %1519 = dma.done.wait [#allocation3], 4608  }
   0xa   :  { %1520 = vsyncadd [#allocation3], 4294962688 }
   0xb   :  { %1521 = dma.done.wait [#allocation6], 12288  }
   0xc   :  { %1522 = vsyncadd [#allocation6], 4294955008  ;;  %v76_v0 = vld [vmem:[#allocation2 + $0xf0] sm:$0xff]  ;;  %v75_v1 = vld [vmem:[#allocation2 + $0xe8] sm:$0xff]  ;;  %vm172_vm0 = vcmask 261120   ;;  %vm323_vm1 = vcmask 1040384  }
   0xd   :  { %v70_v2 = vld [vmem:[#allocation2 + $0xa8] sm:$0xff]  ;;  %260 = vmatpush.msra.mxu3 %v76_v0  ;;  %237 = vmatpush.msra.mxu2 %v75_v1  ;;  %v69_v3 = vld [vmem:[#allocation2 + $0xa0] sm:$0xff]  ;;  %v63_v5 = vld [vmem:[#allocation2 + $0x58] sm:$0xff]  ;;  %vm325_vm2 = vcmask 1041409   ;;  %vm328_vm3 = vcmask 1042434   ;;  %vm331_vm4 = vcmask 1043459  }
   0xe   :  { %v64_v4 = vld [vmem:[#allocation2 + $0x60] sm:$0xff]  ;;  %v73_v6 = vld [vmem:[#allocation2 + $0xd8] sm:$0xff]  ;;  %v67_v8 = vld [vmem:[#allocation2 + $0x90] sm:$0xff]  ;;  %vm334_vm5 = vcmask 1044484   ;;  %vm337_vm6 = vcmask 1045509   ;;  %vm340_vm7 = vcmask 1046534  }
   0xf   :  { %261 = vmatpush.msra.mxu3 %v70_v2  ;;  %238 = vmatpush.msra.mxu2 %v69_v3  ;;  %v74_v7 = vld [vmem:[#allocation2 + $0xe0] sm:$0xff]  ;;  %v58_v9 = vld [vmem:[#allocation2 + $0x18] sm:$0xff]  ;;  %v57_v10 = vld [vmem:[#allocation2 + $0x10] sm:$0xff]  ;;  %vm1945_vm8 = vcmask 1046528   ;;  %vm635_vm15 = vcmask 64512   ;;  %s1322_s3 = sshll.u32 %s1944_s5, 4  ;;  %s1323_s3 = int_to_ptr.hbm [resolvable:$true] %s1322_s3 }
  0x10   :  { %191 = vmatpush.msra.mxu0 %v73_v6  ;;  %214 = vmatpush.msra.mxu1 %v74_v7  ;;  %v68_v11 = vld [vmem:[#allocation2 + $0x98] sm:$0xff]  ;;  %v1574_v12 = vld [vmem:[%s1939_s0] sm:$0xff]  ;;  %v61_v13 = vld [vmem:[#allocation2 + $0x48] sm:$0xff]  ;;  %s1533_s7 = smov 128   ;;  %s1534_s8 = smov 8  }
  0x11   :  { %262 = vmatpush.msra.mxu3 %v64_v4  ;;  %239 = vmatpush.msra.mxu2 %v63_v5  ;;  %v62_v14 = vld [vmem:[#allocation2 + $0x50] sm:$0xff]  ;;  %v148_v15 = vld [vmem:[#allocation5 + $0x178] sm:$0xff]  ;;  %v55_v17 = vld [vmem:[#allocation2] sm:$0xff] }
  0x12   :  { %192 = vmatpush.msra.mxu0 %v67_v8  ;;  %215 = vmatpush.msra.mxu1 %v68_v11  ;;  %v164_v16 = vld [vmem:[#allocation5 + $0x2f8] sm:$0xff]  ;;  %v56_v18 = vld [vmem:[#allocation2 + $0x8] sm:$0xff]  ;;  %v147_v19 = vld [vmem:[#allocation5 + $0x160] sm:$0xff] }
  0x13   :  { %263 = vmatpush.msra.mxu3 %v58_v9  ;;  %240 = vmatpush.msra.mxu2 %v57_v10  ;;  %v163_v20 = vld [vmem:[#allocation5 + $0x2e0] sm:$0xff]  ;;  %v146_v21 = vld [vmem:[#allocation5 + $0x148] sm:$0xff]  ;;  %v145_v24 = vld [vmem:[#allocation5 + $0x130] sm:$0xff] }
  0x14   :  { %1342 = vmatmul.msk.f32.vlgmr.msra.gmra.mxu3 %vm172_vm0, %v1574_v12  ;;  %1340 = vmatmul.msk.f32.vlgmr.msra.gmra.mxu2 %vm172_vm0, %v1574_v12  ;;  %v162_v22 = vld [vmem:[#allocation5 + $0x2c8] sm:$0xff]  ;;  %v161_v25 = vld [vmem:[#allocation5 + $0x2b0] sm:$0xff]  ;;  %v144_v26 = vld [vmem:[#allocation5 + $0x118] sm:$0xff] }
  0x15   :  { %193 = vmatpush.msra.mxu0 %v61_v13  ;;  %216 = vmatpush.msra.mxu1 %v62_v14  ;;  %v1587_v23 = vld [vmem:[%s1939_s0 + $0x8] sm:$0xff]  ;;  %v160_v27 = vld [vmem:[#allocation5 + $0x298] sm:$0xff]  ;;  %v143_v28 = vld [vmem:[#allocation5 + $0x100] sm:$0xff] }
  0x16   :  { %457 = vmatpush.msrb.mxu2 %v148_v15  ;;  %522 = vmatpush.msrb.mxu3 %v164_v16  ;;  %v159_v29 = vld [vmem:[#allocation5 + $0x280] sm:$0xff]  ;;  %v142_v30 = vld [vmem:[#allocation5 + $0xe8] sm:$0xff]  ;;  %v141_v32 = vld [vmem:[#allocation5 + $0xd0] sm:$0xff] }
  0x17   :  { %194 = vmatpush.msra.mxu0 %v55_v17  ;;  %217 = vmatpush.msra.mxu1 %v56_v18  ;;  %v158_v31 = vld [vmem:[#allocation5 + $0x268] sm:$0xff]  ;;  %v157_v33 = vld [vmem:[#allocation5 + $0x250] sm:$0xff]  ;;  %v140_v34 = vld [vmem:[#allocation5 + $0xb8] sm:$0xff] }
  0x18   :  { %1336 = vmatmul.msk.f32.vlgmr.msra.gmra.mxu0 %vm172_vm0, %v1574_v12  ;;  %1338 = vmatmul.msk.f32.vlgmr.msra.gmra.mxu1 %vm172_vm0, %v1574_v12  ;;  %v156_v35 = vld [vmem:[#allocation5 + $0x238] sm:$0xff]  ;;  %v139_v36 = vld [vmem:[#allocation5 + $0xa0] sm:$0xff]  ;;  %v138_v38 = vld [vmem:[#allocation5 + $0x88] sm:$0xff] }
  0x19   :  { %458 = vmatpush.msrb.mxu2 %v147_v19  ;;  %523 = vmatpush.msrb.mxu3 %v163_v20  ;;  %v155_v37 = vld [vmem:[#allocation5 + $0x220] sm:$0xff]  ;;  %v154_v39 = vld [vmem:[#allocation5 + $0x208] sm:$0xff]  ;;  %v137_v40 = vld [vmem:[#allocation5 + $0x70] sm:$0xff] }
  0x1a   :  { %v153_v41 = vld [vmem:[#allocation5 + $0x1f0] sm:$0xff]  ;;  %v136_v42 = vld [vmem:[#allocation5 + $0x58] sm:$0xff]  ;;  %v135_v44 = vld [vmem:[#allocation5 + $0x40] sm:$0xff] }
  0x1b   :  { %459 = vmatpush.msrb.mxu2 %v146_v21  ;;  %524 = vmatpush.msrb.mxu3 %v162_v22  ;;  %v152_v43 = vld [vmem:[#allocation5 + $0x1d8] sm:$0xff]  ;;  %v151_v45 = vld [vmem:[#allocation5 + $0x1c0] sm:$0xff]  ;;  %v134_v46 = vld [vmem:[#allocation5 + $0x28] sm:$0xff] }
  0x1c   :  { %1343 = vmatmul.msk.f32.gmra.mxu3 %vm172_vm0, %v1587_v23  ;;  %1341 = vmatmul.msk.f32.gmra.mxu2 %vm172_vm0, %v1587_v23  ;;  %v150_v47 = vld [vmem:[#allocation5 + $0x1a8] sm:$0xff]  ;;  %v133_v48 = vld [vmem:[#allocation5 + $0x10] sm:$0xff] }
  0x1d   :  { %460 = vmatpush.msrb.mxu2 %v145_v24  ;;  %525 = vmatpush.msrb.mxu3 %v161_v25  ;;  %v149_v49 = vld [vmem:[#allocation5 + $0x190] sm:$0xff] }
  0x1f   :  { %461 = vmatpush.msrb.mxu2 %v144_v26  ;;  %526 = vmatpush.msrb.mxu3 %v160_v27 }
  0x20   :  { %1337 = vmatmul.msk.f32.gmra.mxu0 %vm172_vm0, %v1587_v23  ;;  %1339 = vmatmul.msk.f32.gmra.mxu1 %vm172_vm0, %v1587_v23 }
  0x21   :  { %462 = vmatpush.msrb.mxu2 %v143_v28  ;;  %527 = vmatpush.msrb.mxu3 %v159_v29 }
  0x23   :  { %463 = vmatpush.msrb.mxu2 %v142_v30  ;;  %528 = vmatpush.msrb.mxu3 %v158_v31 }
  0x25   :  { %464 = vmatpush.msrb.mxu2 %v141_v32  ;;  %529 = vmatpush.msrb.mxu3 %v157_v33 }
  0x27   :  { %465 = vmatpush.msrb.mxu2 %v140_v34  ;;  %530 = vmatpush.msrb.mxu3 %v156_v35 }
  0x29   :  { %466 = vmatpush.msrb.mxu2 %v139_v36  ;;  %531 = vmatpush.msrb.mxu3 %v155_v37 }
  0x2b   :  { %467 = vmatpush.msrb.mxu2 %v138_v38  ;;  %532 = vmatpush.msrb.mxu3 %v154_v39 }
  0x2d   :  { %468 = vmatpush.msrb.mxu2 %v137_v40  ;;  %533 = vmatpush.msrb.mxu3 %v153_v41 }
  0x2f   :  { %469 = vmatpush.msrb.mxu2 %v136_v42  ;;  %534 = vmatpush.msrb.mxu3 %v152_v43 }
  0x31   :  { %470 = vmatpush.msrb.mxu2 %v135_v44  ;;  %535 = vmatpush.msrb.mxu3 %v151_v45 }
  0x33   :  { %471 = vmatpush.msrb.mxu2 %v134_v46  ;;  %536 = vmatpush.msrb.mxu3 %v150_v47 }
  0x35   :  { %472 = vmatpush.msrb.mxu2 %v133_v48  ;;  %537 = vmatpush.msrb.mxu3 %v149_v49 }
  0x95   :  { %v1599_v53 = vpop.f32.mrf.mxu0  ;;  %v1601_v54 = vpop.f32.mrf.mxu1 }
  0x97   :  { %v265_v50 = vpop.f32.mrf.mxu3  ;;  %v1597_v51 = vpop.f32.mrf.mxu2 }
  0x98   :  { %v321_v52 = vrot.slane %v265_v50, 7 }
  0x9a   :  { %v324_v55 = vsel %vm323_vm1, %v1597_v51, %v321_v52  ;;  %v326_v56 = vsel %vm325_vm2, %v1597_v51, %v321_v52  ;;  %v329_v0 = vsel %vm328_vm3, %v1597_v51, %v321_v52  ;;  %v332_v6 = vsel %vm331_vm4, %v1597_v51, %v321_v52 }
  0x9b   :  { %v361_v57 = vperm.slane %v324_v55, 0  ;;  %v362_v58 = vperm.slane %v324_v55, 1  ;;  %v327_v61 = vrot.slane %v326_v56, 1  ;;  %v330_v3 = vrot.slane %v329_v0, 2 }
  0x9c   :  { %v333_v9 = vrot.slane %v332_v6, 3  ;;  %v335_v13 = vsel %vm334_vm5, %v1597_v51, %v321_v52  ;;  %v338_v19 = vsel %vm337_vm6, %v1597_v51, %v321_v52  ;;  %v341_v26 = vsel %vm340_vm7, %v1597_v51, %v321_v52 }
  0x9d   :  { %v425_v59 = vmul.f32 %v361_v57, %v1599_v53  ;;  %v426_v60 = vmul.f32 %v362_v58, %v1601_v54  ;;  %v363_v62 = vperm.slane %v327_v61, 0  ;;  %v364_v63 = vperm.slane %v327_v61, 1  ;;  %v199_v46 = vpop.f32.mrf.mxu0  ;;  %v222_v47 = vpop.f32.mrf.mxu1 }
  0x9e   :  { %v365_v4 = vperm.slane %v330_v3, 0  ;;  %v366_v5 = vperm.slane %v330_v3, 1  ;;  %v367_v10 = vperm.slane %v333_v9, 0  ;;  %v368_v11 = vperm.slane %v333_v9, 1 }
  0x9f   :  { %473 = vmatmul.f32.vlgmr.msrb.gmra.mxu2 %v425_v59  ;;  %538 = vmatmul.f32.vlgmr.msrb.gmra.mxu3 %v426_v60  ;;  %v427_v1 = vmul.f32 %v363_v62, %v1599_v53  ;;  %v428_v2 = vmul.f32 %v364_v63, %v1601_v54  ;;  %v336_v16 = vrot.slane %v335_v13, 4  ;;  %v339_v22 = vrot.slane %v338_v19, 5  ;;  %v268_v36 = vpop.f32.mrf.mxu3  ;;  %v245_v40 = vpop.f32.mrf.mxu2 }
  0xa0   :  { %v429_v7 = vmul.f32 %v365_v4, %v1599_v53  ;;  %v430_v8 = vmul.f32 %v366_v5, %v1601_v54  ;;  %v431_v14 = vmul.f32 %v367_v10, %v1599_v53  ;;  %v432_v15 = vmul.f32 %v368_v11, %v1601_v54 }
  0xa1   :  { %v369_v17 = vperm.slane %v336_v16, 0  ;;  %v370_v18 = vperm.slane %v336_v16, 1  ;;  %v371_v24 = vperm.slane %v339_v22, 0  ;;  %v372_v25 = vperm.slane %v339_v22, 1 }
  0xa2   :  { %v342_v29 = vrot.slane %v341_v26, 6  ;;  %v344_v32 = vsel %vm1945_vm8, %v321_v52, %v1597_v51  ;;  %v322_v39 = vrot.slane %v268_v36, 7 }
  0xa3   :  { %v433_v20 = vmul.f32 %v369_v17, %v1599_v53  ;;  %v434_v21 = vmul.f32 %v370_v18, %v1601_v54  ;;  %v435_v27 = vmul.f32 %v371_v24, %v1599_v53  ;;  %v436_v28 = vmul.f32 %v372_v25, %v1601_v54 }
  0xa4   :  { %v373_v30 = vperm.slane %v342_v29, 0  ;;  %v374_v31 = vperm.slane %v342_v29, 1  ;;  %v345_v35 = vrot.slane %v344_v32, 7  ;;  %v346_v41 = vsel %vm323_vm1, %v245_v40, %v322_v39 }
  0xa5   :  { %v377_v44 = vperm.slane %v346_v41, 0  ;;  %v378_v45 = vperm.slane %v346_v41, 1  ;;  %v347_v48 = vsel %vm325_vm2, %v245_v40, %v322_v39  ;;  %v349_v56 = vsel %vm328_vm3, %v245_v40, %v322_v39 }
  0xa6   :  { %v437_v33 = vmul.f32 %v373_v30, %v1599_v53  ;;  %v438_v34 = vmul.f32 %v374_v31, %v1601_v54  ;;  %v375_v37 = vperm.slane %v345_v35, 0  ;;  %v376_v38 = vperm.slane %v345_v35, 1 }
  0xa7   :  { %476 = vmatmul.f32.gmra.mxu2 %v427_v1  ;;  %541 = vmatmul.f32.gmra.mxu3 %v428_v2  ;;  %v441_v49 = vmul.f32 %v377_v44, %v199_v46  ;;  %v442_v50 = vmul.f32 %v378_v45, %v222_v47  ;;  %v348_v51 = vrot.slane %v347_v48, 1  ;;  %v351_v60 = vsel %vm331_vm4, %v245_v40, %v322_v39  ;;  %v587_v44 = vld [vmem:[%s1940_s1] sm:$0xff]  ;;  %v588_v45 = vld [vmem:[%s1940_s1 + $0x8] sm:$0xff] }
  0xa8   :  { %v439_v42 = vmul.f32 %v375_v37, %v1599_v53  ;;  %v440_v43 = vmul.f32 %v376_v38, %v1601_v54  ;;  %v350_v54 = vrot.slane %v349_v56, 2  ;;  %v352_v63 = vrot.slane %v351_v60, 3  ;;  %v591_v48 = vld [vmem:[%s1940_s1 + $0x20] sm:$0xff] }
  0xa9   :  { %v379_v52 = vperm.slane %v348_v51, 0  ;;  %v380_v55 = vperm.slane %v348_v51, 1  ;;  %v353_v2 = vsel %vm334_vm5, %v245_v40, %v322_v39  ;;  %vm603_vm11 = vcmp.gt.f32.partialorder %v587_v44, 0.5  ;;  %v78_v60 = vld [vmem:[#allocation2 + $0x100] sm:$0xff] }
  0xaa   :  { %v381_v58 = vperm.slane %v350_v54, 0  ;;  %v382_v59 = vperm.slane %v350_v54, 1  ;;  %v383_v0 = vperm.slane %v352_v63, 0  ;;  %v384_v1 = vperm.slane %v352_v63, 1  ;;  %v594_v63 = vld [vmem:[%s1940_s1 + $0x38] sm:$0xff]  ;;  %306 = vmatpush.msrb.mxu1 %v78_v60 }
  0xab   :  { %v443_v53 = vmul.f32 %v379_v52, %v199_v46  ;;  %v444_v57 = vmul.f32 %v380_v55, %v222_v47  ;;  %v354_v5 = vrot.slane %v353_v2, 4  ;;  %vm604_vm12 = vcmp.gt.f32.partialorder %v588_v45, 0.5  ;;  %v77_v2 = vld [vmem:[#allocation2 + $0xf8] sm:$0xff] }
  0xac   :  { %v445_v61 = vmul.f32 %v381_v58, %v199_v46  ;;  %v446_v62 = vmul.f32 %v382_v59, %v222_v47  ;;  %v447_v3 = vmul.f32 %v383_v0, %v199_v46  ;;  %v448_v4 = vmul.f32 %v384_v1, %v222_v47  ;;  %283 = vmatpush.msrb.mxu0 %v77_v2 }
  0xad   :  { %v385_v6 = vperm.slane %v354_v5, 0  ;;  %vm607_vm13 = vcmp.gt.f32.partialorder %v591_v48, 0.5 }
  0xaf   :  { %479 = vmatmul.f32.gmra.mxu2 %v429_v7  ;;  %544 = vmatmul.f32.gmra.mxu3 %v430_v8  ;;  %v386_v7 = vperm.slane %v354_v5, 1  ;;  %v355_v8 = vsel %vm337_vm6, %v245_v40, %v322_v39  ;;  %v449_v9 = vmul.f32 %v385_v6, %v199_v46 }
  0xb0   :  { %v356_v11 = vrot.slane %v355_v8, 5  ;;  %v71_v8 = vld [vmem:[#allocation2 + $0xb0] sm:$0xff] }
  0xb1   :  { %v450_v10 = vmul.f32 %v386_v7, %v222_v47  ;;  %284 = vmatpush.msrb.mxu0 %v71_v8 }
  0xb2   :  { %v387_v13 = vperm.slane %v356_v11, 0 }
  0xb4   :  { %v451_v16 = vmul.f32 %v387_v13, %v199_v46 }
  0xb7   :  { %482 = vmatmul.f32.gmra.mxu2 %v431_v14  ;;  %547 = vmatmul.f32.gmra.mxu3 %v432_v15  ;;  %v388_v14 = vperm.slane %v356_v11, 1  ;;  %v357_v15 = vsel %vm340_vm7, %v245_v40, %v322_v39 }
  0xb8   :  { %v358_v18 = vrot.slane %v357_v15, 6 }
  0xb9   :  { %v452_v17 = vmul.f32 %v388_v14, %v222_v47 }
  0xba   :  { %v389_v19 = vperm.slane %v358_v18, 0 }
  0xbc   :  { %v453_v22 = vmul.f32 %v389_v19, %v199_v46  ;;  %v65_v19 = vld [vmem:[#allocation2 + $0x68] sm:$0xff] }
  0xbd   :  { %285 = vmatpush.msrb.mxu0 %v65_v19 }
  0xbf   :  { %485 = vmatmul.f32.gmra.mxu2 %v433_v20  ;;  %550 = vmatmul.f32.gmra.mxu3 %v434_v21  ;;  %v390_v20 = vperm.slane %v358_v18, 1  ;;  %v359_v21 = vsel %vm1945_vm8, %v322_v39, %v245_v40 }
  0xc0   :  { %v360_v25 = vrot.slane %v359_v21, 7 }
  0xc1   :  { %v454_v24 = vmul.f32 %v390_v20, %v222_v47  ;;  %v60_v20 = vld [vmem:[#allocation2 + $0x28] sm:$0xff] }
  0xc2   :  { %v391_v26 = vperm.slane %v360_v25, 0 }
  0xc7   :  { %488 = vmatmul.f32.gmra.mxu2 %v435_v27  ;;  %553 = vmatmul.f32.gmra.mxu3 %v436_v28  ;;  %v392_v27 = vperm.slane %v360_v25, 1  ;;  %v455_v28 = vmul.f32 %v391_v26, %v199_v46  ;;  %v59_v26 = vld [vmem:[#allocation2 + $0x20] sm:$0xff] }
  0xc8   :  { %286 = vmatpush.msrb.mxu0 %v59_v26  ;;  %v596_v26 = vld [vmem:[%s1940_s1 + $0x48] sm:$0xff] }
  0xc9   :  { %v456_v29 = vmul.f32 %v392_v27, %v222_v47  ;;  %1344 = vmatmul.msk.f32.vlgmr.msrb.gmra.mxu0 %vm172_vm0, %v1574_v12 }
  0xcf   :  { %491 = vmatmul.f32.gmra.mxu2 %v437_v33  ;;  %556 = vmatmul.f32.gmra.mxu3 %v438_v34 }
  0xd1   :  { %1345 = vmatmul.msk.f32.gmra.mxu0 %vm172_vm0, %v1587_v23 }
  0xd7   :  { %494 = vmatmul.f32.gmra.mxu2 %v439_v42  ;;  %559 = vmatmul.f32.gmra.mxu3 %v440_v43  ;;  %v589_v42 = vld [vmem:[%s1940_s1 + $0x10] sm:$0xff]  ;;  %v590_v43 = vld [vmem:[%s1940_s1 + $0x18] sm:$0xff] }
  0xd8   :  { %vm605_vm9 = vcmp.gt.f32.partialorder %v589_v42, 0.5  ;;  %vm606_vm10 = vcmp.gt.f32.partialorder %v590_v43, 0.5 }
  0xdf   :  { %497 = vmatmul.f32.gmra.mxu2 %v441_v49  ;;  %562 = vmatmul.f32.gmra.mxu3 %v442_v50  ;;  %v592_v49 = vld [vmem:[%s1940_s1 + $0x28] sm:$0xff] }
  0xe0   :  { %vm608_vm14 = vcmp.gt.f32.partialorder %v592_v49, 0.5 }
  0xe7   :  { %500 = vmatmul.f32.gmra.mxu2 %v443_v53  ;;  %565 = vmatmul.f32.gmra.mxu3 %v444_v57  ;;  %v593_v57 = vld [vmem:[%s1940_s1 + $0x30] sm:$0xff] }
  0xe8   :  { %vm609_vm8 = vcmp.gt.f32.partialorder %v593_v57, 0.5 }
  0xef   :  { %503 = vmatmul.f32.gmra.mxu2 %v445_v61  ;;  %568 = vmatmul.f32.gmra.mxu3 %v446_v62 }
  0xf7   :  { %506 = vmatmul.f32.gmra.mxu2 %v447_v3  ;;  %571 = vmatmul.f32.gmra.mxu3 %v448_v4  ;;  %v72_v3 = vld [vmem:[#allocation2 + $0xb8] sm:$0xff] }
  0xf8   :  { %307 = vmatpush.msrb.mxu1 %v72_v3 }
  0xff   :  { %509 = vmatmul.f32.gmra.mxu2 %v449_v9  ;;  %574 = vmatmul.f32.gmra.mxu3 %v450_v10  ;;  %v66_v9 = vld [vmem:[#allocation2 + $0x70] sm:$0xff] }
 0x100   :  { %308 = vmatpush.msrb.mxu1 %v66_v9 }
 0x102   :  { %309 = vmatpush.msrb.mxu1 %v60_v20 }
 0x103   :  { %1346 = vmatmul.msk.f32.vlgmr.msrb.gmra.mxu1 %vm172_vm0, %v1574_v12 }
 0x107   :  { %512 = vmatmul.f32.gmra.mxu2 %v451_v16  ;;  %577 = vmatmul.f32.gmra.mxu3 %v452_v17 }
 0x10b   :  { %1347 = vmatmul.msk.f32.gmra.mxu1 %vm172_vm0, %v1587_v23 }
 0x10f   :  { %515 = vmatmul.f32.gmra.mxu2 %v453_v22  ;;  %580 = vmatmul.f32.gmra.mxu3 %v454_v24 }
 0x117   :  { %518 = vmatmul.f32.gmra.mxu2 %v455_v28  ;;  %583 = vmatmul.f32.gmra.mxu3 %v456_v29  ;;  %v83_v28 = vld [vmem:[#allocation2 + $0x38] sm:$0xff]  ;;  %v84_v29 = vld [vmem:[#allocation2 + $0x40] sm:$0xff] }
 0x118   :  { %890 = vmatpush.msra.mxu1 %v84_v29  ;;  %825 = vmatpush.msra.mxu0 %v83_v28  ;;  %v599_v29 = vld [vmem:[%s1940_s1 + $0x60] sm:$0xff] }
 0x122   :  { %v474_v30 = vpop.f32.mrf.mxu2  ;;  %v539_v31 = vpop.f32.mrf.mxu3 }
 0x123   :  { %v540_v50 = vadd.f32 %v539_v31, %v474_v30 }
 0x125   :  { %v619_v61 = vsel %vm603_vm11, %v540_v50, -1e+30 }
 0x126   :  { %v636_v6 = vsel %vm635_vm15, %v619_v61, -inf }
 0x12a   :  { %v477_v32 = vpop.f32.mrf.mxu2  ;;  %v542_v33 = vpop.f32.mrf.mxu3 }
 0x12b   :  { %v543_v51 = vadd.f32 %v542_v33, %v477_v32 }
 0x12d   :  { %v620_v62 = vsel %vm604_vm12, %v543_v51, -1e+30  ;;  %vm612_vm12 = vcmp.gt.f32.partialorder %v596_v26, 0.5 }
 0x12e   :  { %v637_v10 = vsel %vm635_vm15, %v620_v62, -inf }
 0x132   :  { %v480_v34 = vpop.f32.mrf.mxu2  ;;  %v545_v35 = vpop.f32.mrf.mxu3 }
 0x133   :  { %v546_v46 = vadd.f32 %v545_v35, %v480_v34 }
 0x135   :  { %v621_v54 = vsel %vm605_vm9, %v546_v46, -1e+30  ;;  %vm610_vm9 = vcmp.gt.f32.partialorder %v594_v63, 0.5 }
 0x136   :  { %v638_v4 = vsel %vm635_vm15, %v621_v54, -inf }
 0x137   :  { %v639_v16 = vmax.f32 %v636_v6, %v638_v4 }
 0x13a   :  { %v483_v36 = vpop.f32.mrf.mxu2  ;;  %v548_v37 = vpop.f32.mrf.mxu3 }
 0x13b   :  { %v549_v47 = vadd.f32 %v548_v37, %v483_v36 }
 0x13d   :  { %v1664_v58 = vsel %vm606_vm10, %v549_v47, -1e+30 }
 0x13e   :  { %v640_v5 = vsel %vm635_vm15, %v1664_v58, -inf }
 0x13f   :  { %v641_v17 = vmax.f32 %v637_v10, %v640_v5 }
 0x142   :  { %v486_v38 = vpop.f32.mrf.mxu2  ;;  %v551_v39 = vpop.f32.mrf.mxu3 }
 0x143   :  { %v552_v56 = vadd.f32 %v551_v39, %v486_v38 }
 0x145   :  { %v623_v0 = vsel %vm607_vm13, %v552_v56, -1e+30  ;;  %vm615_vm13 = vcmp.gt.f32.partialorder %v599_v29, 0.5 }
 0x146   :  { %v642_v11 = vsel %vm635_vm15, %v623_v0, -inf }
 0x147   :  { %v643_v22 = vmax.f32 %v639_v16, %v642_v11 }
 0x14a   :  { %v489_v40 = vpop.f32.mrf.mxu2  ;;  %v554_v41 = vpop.f32.mrf.mxu3 }
 0x14b   :  { %v555_v53 = vadd.f32 %v554_v41, %v489_v40 }
 0x14d   :  { %v1669_v1 = vsel %vm608_vm14, %v555_v53, -1e+30 }
 0x14e   :  { %v644_v13 = vsel %vm635_vm15, %v1669_v1, -inf }
 0x14f   :  { %v645_v24 = vmax.f32 %v641_v17, %v644_v13 }
 0x152   :  { %v492_v52 = vpop.f32.mrf.mxu2  ;;  %v557_v55 = vpop.f32.mrf.mxu3 }
 0x153   :  { %v558_v59 = vadd.f32 %v557_v55, %v492_v52 }
 0x155   :  { %v625_v7 = vsel %vm609_vm8, %v558_v59, -1e+30 }
 0x156   :  { %v646_v21 = vsel %vm635_vm15, %v625_v7, -inf }
 0x157   :  { %v647_v30 = vmax.f32 %v643_v22, %v646_v21  ;;  %v597_v22 = vld [vmem:[%s1940_s1 + $0x50] sm:$0xff] }
 0x158   :  { %vm613_vm8 = vcmp.gt.f32.partialorder %v597_v22, 0.5 }
 0x15a   :  { %v495_v14 = vpop.f32.mrf.mxu2  ;;  %v560_v15 = vpop.f32.mrf.mxu3 }
 0x15b   :  { %v561_v18 = vadd.f32 %v560_v15, %v495_v14 }
 0x15d   :  { %v626_v25 = vsel %vm610_vm9, %v561_v18, -1e+30 }
 0x15e   :  { %v648_v27 = vsel %vm635_vm15, %v626_v25, -inf }
 0x15f   :  { %v649_v31 = vmax.f32 %v645_v24, %v648_v27  ;;  %v598_v24 = vld [vmem:[%s1940_s1 + $0x58] sm:$0xff] }
 0x160   :  { %vm614_vm10 = vcmp.gt.f32.partialorder %v598_v24, 0.5 }
 0x161   :  { %v650_v32 = vmax.f32 %v647_v30, %v649_v31  ;;  %v600_v30 = vld [vmem:[%s1940_s1 + $0x68] sm:$0xff] }
 0x162   :  { %v1685_v33 = vpop.f32.mrf.mxu2  ;;  %v1687_v34 = vpop.f32.mrf.mxu3  ;;  %vm616_vm14 = vcmp.gt.f32.partialorder %v600_v30, 0.5 }
 0x163   :  { %v666_v35 = vsub.f32 %v619_v61, %v650_v32  ;;  %v667_v36 = vsub.f32 %v620_v62, %v650_v32  ;;  %v668_v37 = vsub.f32 %v621_v54, %v650_v32  ;;  %v669_v38 = vsub.f32 %v1664_v58, %v650_v32 }
 0x164   :  { %v670_v39 = vsub.f32 %v623_v0, %v650_v32  ;;  %v671_v12 = vsub.f32 %v1669_v1, %v650_v32  ;;  %v672_v44 = vsub.f32 %v625_v7, %v650_v32  ;;  %v673_v46 = vsub.f32 %v626_v25, %v650_v32  ;;  %v595_v25 = vld [vmem:[%s1940_s1 + $0x40] sm:$0xff] }
 0x165   :  { %v682_v40 = vmul.f32 1.442695, %v666_v35  ;;  %v684_v41 = vmul.f32 1.442695, %v667_v36  ;;  %v686_v42 = vmul.f32 1.442695, %v668_v37  ;;  %v564_v31 = vadd.f32 %v1687_v34, %v1685_v33 }
 0x166   :  { %v688_v43 = vmul.f32 1.442695, %v669_v38  ;;  %v690_v45 = vmul.f32 1.442695, %v670_v39  ;;  %v692_v47 = vmul.f32 1.442695, %v671_v12 }
 0x167   :  { %1399 = vpow2.f32 %v682_v40  ;;  %v694_v50 = vmul.f32 1.442695, %v672_v44  ;;  %v696_v55 = vmul.f32 1.442695, %v673_v46  ;;  %vm611_vm11 = vcmp.gt.f32.partialorder %v595_v25, 0.5  ;;  %v601_v39 = vld [vmem:[%s1940_s1 + $0x70] sm:$0xff] }
 0x168   :  { %1401 = vpow2.f32 %v684_v41  ;;  %v627_v34 = vsel %vm611_vm11, %v564_v31, -1e+30  ;;  %vm617_vm9 = vcmp.gt.f32.partialorder %v601_v39, 0.5 }
 0x169   :  { %1403 = vpow2.f32 %v686_v42 }
 0x16a   :  { %1405 = vpow2.f32 %v688_v43  ;;  %v501_v48 = vpop.f32.mrf.mxu2  ;;  %v566_v49 = vpop.f32.mrf.mxu3 }
 0x16b   :  { %1407 = vpow2.f32 %v690_v45  ;;  %v567_v32 = vadd.f32 %v566_v49, %v501_v48  ;;  %v602_v45 = vld [vmem:[%s1940_s1 + $0x78] sm:$0xff]  ;;  %v651_v48 = vsel %vm635_vm15, %v627_v34, -inf }
 0x16c   :  { %1409 = vpow2.f32 %v692_v47 }
 0x16d   :  { %v1400_v51 = vpop.eup %1399  ;;  %1411 = vpow2.f32 %v694_v50  ;;  %v628_v12 = vsel %vm612_vm12, %v567_v32, -1e+30 }
 0x16e   :  { %v1402_v52 = vpop.eup %1401  ;;  %v714_v56 = vsel %vm635_vm15, %v1400_v51, 0.0  ;;  %1413 = vpow2.f32 %v696_v55  ;;  %v652_v50 = vsel %vm635_vm15, %v628_v12, -inf }
 0x16f   :  { %v1404_v53 = vpop.eup %1403  ;;  %v715_v23 = vsel %vm635_vm15, %v1402_v52, 0.0 }
 0x170   :  { %v1697_v57 = vpop.eup %1405  ;;  %v716_v54 = vadd.f32 %v715_v23, %v714_v56  ;;  %v717_v58 = vsel %vm635_vm15, %v1404_v53, 0.0 }
 0x171   :  { %v1700_v59 = vpop.eup %1407  ;;  %v719_v63 = vsel %vm635_vm15, %v1697_v57, 0.0 }
 0x172   :  { %v718_v60 = vadd.f32 %v717_v58, %v716_v54  ;;  %v504_v61 = vpop.f32.mrf.mxu2  ;;  %v569_v62 = vpop.f32.mrf.mxu3  ;;  %v721_v2 = vsel %vm635_vm15, %v1700_v59, 0.0 }
 0x173   :  { %v1704_v0 = vpop.eup %1409  ;;  %v570_v27 = vadd.f32 %v569_v62, %v504_v61 }
 0x174   :  { %v720_v1 = vadd.f32 %v719_v63, %v718_v60  ;;  %v1708_v3 = vpop.eup %1411  ;;  %v723_v5 = vsel %vm635_vm15, %v1704_v0, 0.0 }
 0x175   :  { %v1712_v6 = vpop.eup %1413  ;;  %v725_v8 = vsel %vm635_vm15, %v1708_v3, 0.0  ;;  %v629_v40 = vsel %vm613_vm8, %v570_v27, -1e+30  ;;  %vm618_vm8 = vcmp.gt.f32.partialorder %v602_v45, 0.5 }
 0x176   :  { %v722_v4 = vadd.f32 %v721_v2, %v720_v1  ;;  %v727_v13 = vsel %vm635_vm15, %v1712_v6, 0.0  ;;  %v653_v46 = vsel %vm635_vm15, %v629_v40, -inf }
 0x178   :  { %v724_v7 = vadd.f32 %v723_v5, %v722_v4 }
 0x17a   :  { %v726_v9 = vadd.f32 %v725_v8, %v724_v7  ;;  %v507_v10 = vpop.f32.mrf.mxu2  ;;  %v572_v11 = vpop.f32.mrf.mxu3 }
 0x17b   :  { %v573_v28 = vadd.f32 %v572_v11, %v507_v10 }
 0x17c   :  { %v728_v14 = vadd.f32 %v727_v13, %v726_v9 }
 0x17d   :  { %v630_v41 = vsel %vm614_vm10, %v573_v28, -1e+30  ;;  %vm1946_vm10 = vcmask 1046528  }
 0x17e   :  { %1415 = vrcp.f32 %v728_v14  ;;  %v655_v47 = vsel %vm635_vm15, %v630_v41, -inf }
 0x17f   :  { %v656_v23 = vmax.f32 %v652_v50, %v655_v47 }
 0x182   :  { %v510_v15 = vpop.f32.mrf.mxu2  ;;  %v575_v16 = vpop.f32.mrf.mxu3 }
 0x183   :  { %v576_v37 = vadd.f32 %v575_v16, %v510_v15 }
 0x184   :  { %v1718_v17 = vpop.eup %1415 }
 0x185   :  { %v746_v18 = vmul.f32 %v1718_v17, %v1400_v51  ;;  %v747_v21 = vmul.f32 %v1718_v17, %v1402_v52  ;;  %v748_v33 = vmul.f32 %v1718_v17, %v1404_v53  ;;  %v631_v43 = vsel %vm615_vm13, %v576_v37, -1e+30 }
 0x186   :  { %v657_v51 = vsel %vm635_vm15, %v631_v43, -inf  ;;  %v654_v53 = vmax.f32 %v651_v48, %v653_v46  ;;  %v749_v63 = vmul.f32 %v1718_v17, %v1697_v57  ;;  %v750_v11 = vmul.f32 %v1718_v17, %v1700_v59 }
 0x187   :  { %1348 = vmatmul.msk.f32.vlgmr.msra.gmra.mxu0 %vm635_vm15, %v746_v18  ;;  %1364 = vmatmul.msk.f32.vlgmr.msra.gmra.mxu1 %vm635_vm15, %v746_v18  ;;  %v751_v59 = vmul.f32 %v1718_v17, %v1704_v0  ;;  %v752_v39 = vmul.f32 %v1718_v17, %v1708_v3  ;;  %v753_v46 = vmul.f32 %v1718_v17, %v1712_v6  ;;  %v100_v6 = vld [vmem:[#allocation5 + $0x168] sm:$0xff] }
 0x188   :  { %v658_v60 = vmax.f32 %v654_v53, %v657_v51  ;;  %v116_v17 = vld [vmem:[#allocation5 + $0x2e8] sm:$0xff]  ;;  %1101 = vmatpush.msrb.mxu0 %v100_v6  ;;  %v99_v53 = vld [vmem:[#allocation5 + $0x150] sm:$0xff] }
 0x189   :  { %1124 = vmatpush.msrb.mxu1 %v116_v17 }
 0x18a   :  { %v513_v19 = vpop.f32.mrf.mxu2  ;;  %v578_v20 = vpop.f32.mrf.mxu3  ;;  %1102 = vmatpush.msrb.mxu0 %v99_v53 }
 0x18b   :  { %v579_v38 = vadd.f32 %v578_v20, %v513_v19 }
 0x18d   :  { %v632_v44 = vsel %vm616_vm14, %v579_v38, -1e+30 }
 0x18e   :  { %v659_v52 = vsel %vm635_vm15, %v632_v44, -inf }
 0x18f   :  { %1349 = vmatmul.msk.f32.gmra.mxu0 %vm635_vm15, %v747_v21  ;;  %1365 = vmatmul.msk.f32.gmra.mxu1 %vm635_vm15, %v747_v21  ;;  %v660_v61 = vmax.f32 %v656_v23, %v659_v52  ;;  %v1803_v52 = vpop.f32.mrf.mxu1  ;;  %v115_v23 = vld [vmem:[#allocation5 + $0x2d0] sm:$0xff] }
 0x190   :  { %1125 = vmatpush.msrb.mxu1 %v115_v23 }
 0x192   :  { %v516_v35 = vpop.f32.mrf.mxu2  ;;  %v581_v36 = vpop.f32.mrf.mxu3 }
 0x193   :  { %v582_v42 = vadd.f32 %v581_v36, %v516_v35 }
 0x195   :  { %v633_v49 = vsel %vm617_vm9, %v582_v42, -1e+30 }
 0x196   :  { %v661_v58 = vsel %vm635_vm15, %v633_v49, -inf }
 0x197   :  { %1350 = vmatmul.msk.f32.gmra.mxu0 %vm635_vm15, %v748_v33  ;;  %1366 = vmatmul.msk.f32.gmra.mxu1 %vm635_vm15, %v748_v33  ;;  %v662_v2 = vmax.f32 %v658_v60, %v661_v58 }
 0x19a   :  { %v519_v55 = vpop.f32.mrf.mxu2  ;;  %v584_v56 = vpop.f32.mrf.mxu3 }
 0x19b   :  { %v585_v54 = vadd.f32 %v584_v56, %v519_v55  ;;  %v1805_v55 = vpop.f32.mrf.mxu0 }
 0x19d   :  { %v634_v62 = vsel %vm618_vm8, %v585_v54, -1e+30  ;;  %v314_v54 = vpop.f32.mrf.mxu1 }
 0x19e   :  { %v663_v1 = vsel %vm635_vm15, %v634_v62, -inf  ;;  %v945_v58 = vrot.slane %v314_v54, 7 }
 0x19f   :  { %v664_v4 = vmax.f32 %v660_v61, %v663_v1  ;;  %1351 = vmatmul.msk.f32.gmra.mxu0 %vm635_vm15, %v749_v63  ;;  %1367 = vmatmul.msk.f32.gmra.mxu1 %vm635_vm15, %v749_v63  ;;  %v98_v61 = vld [vmem:[#allocation5 + $0x138] sm:$0xff] }
 0x1a0   :  { %1103 = vmatpush.msrb.mxu0 %v98_v61 }
 0x1a1   :  { %v665_v5 = vmax.f32 %v662_v2, %v664_v4 }
 0x1a3   :  { %v674_v7 = vsub.f32 %v627_v34, %v665_v5  ;;  %v675_v8 = vsub.f32 %v628_v12, %v665_v5  ;;  %v676_v9 = vsub.f32 %v629_v40, %v665_v5  ;;  %v677_v10 = vsub.f32 %v630_v41, %v665_v5  ;;  %v291_v60 = vpop.f32.mrf.mxu0 }
 0x1a4   :  { %v678_v13 = vsub.f32 %v631_v43, %v665_v5  ;;  %v679_v16 = vsub.f32 %v632_v44, %v665_v5  ;;  %v680_v19 = vsub.f32 %v633_v49, %v665_v5  ;;  %v681_v21 = vsub.f32 %v634_v62, %v665_v5  ;;  %v114_v62 = vld [vmem:[#allocation5 + $0x2b8] sm:$0xff] }
 0x1a5   :  { %v698_v14 = vmul.f32 1.442695, %v674_v7  ;;  %v700_v15 = vmul.f32 1.442695, %v675_v8  ;;  %v702_v57 = vmul.f32 1.442695, %v676_v9  ;;  %v1810_v63 = vsel %vm323_vm1, %v291_v60, %v945_v58  ;;  %1126 = vmatpush.msrb.mxu1 %v114_v62 }
 0x1a6   :  { %v704_v18 = vmul.f32 1.442695, %v677_v10  ;;  %v706_v20 = vmul.f32 1.442695, %v678_v13  ;;  %v708_v22 = vmul.f32 1.442695, %v679_v16  ;;  %v1813_v1 = vsel %vm325_vm2, %v291_v60, %v945_v58 }
 0x1a7   :  { %1352 = vmatmul.msk.f32.gmra.mxu0 %vm635_vm15, %v750_v11  ;;  %1368 = vmatmul.msk.f32.gmra.mxu1 %vm635_vm15, %v750_v11  ;;  %1417 = vpow2.f32 %v698_v14  ;;  %v710_v24 = vmul.f32 1.442695, %v680_v19  ;;  %v712_v27 = vmul.f32 1.442695, %v681_v21  ;;  %v1816_v2 = vsel %vm328_vm3, %v291_v60, %v945_v58  ;;  %v97_v13 = vld [vmem:[#allocation5 + $0x120] sm:$0xff]  ;;  %v112_v16 = vld [vmem:[#allocation5 + $0x288] sm:$0xff] }
 0x1a8   :  { %1419 = vpow2.f32 %v700_v15  ;;  %v1819_v4 = vsel %vm331_vm4, %v291_v60, %v945_v58  ;;  %v1822_v7 = vsel %vm334_vm5, %v291_v60, %v945_v58  ;;  %v1827_v8 = vsel %vm337_vm6, %v291_v60, %v945_v58  ;;  %v113_v14 = vld [vmem:[#allocation5 + $0x2a0] sm:$0xff]  ;;  %1104 = vmatpush.msrb.mxu0 %v97_v13  ;;  %v95_v19 = vld [vmem:[#allocation5 + $0xf0] sm:$0xff] }
 0x1a9   :  { %1421 = vpow2.f32 %v702_v57  ;;  %v1830_v9 = vsel %vm340_vm7, %v291_v60, %v945_v58  ;;  %v1833_v10 = vsel %vm1946_vm10, %v945_v58, %v291_v60  ;;  %1127 = vmatpush.msrb.mxu1 %v113_v14  ;;  %v96_v57 = vld [vmem:[#allocation5 + $0x108] sm:$0xff] }
 0x1aa   :  { %1423 = vpow2.f32 %v704_v18  ;;  %1105 = vmatpush.msrb.mxu0 %v96_v57 }
 0x1ab   :  { %1425 = vpow2.f32 %v706_v20  ;;  %1128 = vmatpush.msrb.mxu1 %v112_v16  ;;  %v111_v20 = vld [vmem:[#allocation5 + $0x270] sm:$0xff] }
 0x1ac   :  { %1427 = vpow2.f32 %v708_v22  ;;  %1106 = vmatpush.msrb.mxu0 %v95_v19 }
 0x1ad   :  { %v1418_v25 = vpop.eup %1417  ;;  %1429 = vpow2.f32 %v710_v24  ;;  %1129 = vmatpush.msrb.mxu1 %v111_v20  ;;  %v110_v24 = vld [vmem:[#allocation5 + $0x258] sm:$0xff] }
 0x1ae   :  { %v1420_v26 = vpop.eup %1419  ;;  %v729_v28 = vsel %vm635_vm15, %v1418_v25, 0.0  ;;  %1431 = vpow2.f32 %v712_v27  ;;  %v93_v27 = vld [vmem:[#allocation5 + $0xc0] sm:$0xff] }
 0x1af   :  { %1353 = vmatmul.msk.f32.gmra.mxu0 %vm635_vm15, %v751_v59  ;;  %1369 = vmatmul.msk.f32.gmra.mxu1 %vm635_vm15, %v751_v59  ;;  %v1422_v29 = vpop.eup %1421  ;;  %v730_v30 = vsel %vm635_vm15, %v1420_v26, 0.0  ;;  %v94_v59 = vld [vmem:[#allocation5 + $0xd8] sm:$0xff] }
 0x1b0   :  { %v1424_v31 = vpop.eup %1423  ;;  %v731_v32 = vadd.f32 %v730_v30, %v729_v28  ;;  %v732_v0 = vsel %vm635_vm15, %v1422_v29, 0.0  ;;  %1107 = vmatpush.msrb.mxu0 %v94_v59  ;;  %1130 = vmatpush.msrb.mxu1 %v110_v24  ;;  %v109_v28 = vld [vmem:[#allocation5 + $0x240] sm:$0xff]  ;;  %v108_v30 = vld [vmem:[#allocation5 + $0x228] sm:$0xff] }
 0x1b1   :  { %v1426_v35 = vpop.eup %1425  ;;  %v734_v37 = vsel %vm635_vm15, %v1424_v31, 0.0 }
 0x1b2   :  { %v733_v36 = vadd.f32 %v732_v0, %v731_v32  ;;  %v1428_v38 = vpop.eup %1427  ;;  %v736_v41 = vsel %vm635_vm15, %v1426_v35, 0.0  ;;  %1108 = vmatpush.msrb.mxu0 %v93_v27  ;;  %1131 = vmatpush.msrb.mxu1 %v109_v28  ;;  %v91_v0 = vld [vmem:[#allocation5 + $0x90] sm:$0xff] }
 0x1b3   :  { %v1782_v42 = vpop.eup %1429  ;;  %v738_v34 = vsel %vm635_vm15, %v1428_v38, 0.0 }
 0x1b4   :  { %v735_v40 = vadd.f32 %v734_v37, %v733_v36  ;;  %v1787_v12 = vpop.eup %1431  ;;  %v740_v44 = vsel %vm635_vm15, %v1782_v42, 0.0  ;;  %1132 = vmatpush.msrb.mxu1 %v108_v30  ;;  %v90_v36 = vld [vmem:[#allocation5 + $0x78] sm:$0xff] }
 0x1b5   :  { %v742_v3 = vsel %vm635_vm15, %v1787_v12, 0.0  ;;  %v106_v37 = vld [vmem:[#allocation5 + $0x1f8] sm:$0xff] }
 0x1b6   :  { %v737_v33 = vadd.f32 %v736_v41, %v735_v40  ;;  %v88_v40 = vld [vmem:[#allocation5 + $0x48] sm:$0xff] }
 0x1b7   :  { %1354 = vmatmul.msk.f32.gmra.mxu0 %vm635_vm15, %v752_v39  ;;  %1370 = vmatmul.msk.f32.gmra.mxu1 %vm635_vm15, %v752_v39  ;;  %v105_v39 = vld [vmem:[#allocation5 + $0x1e0] sm:$0xff]  ;;  %v104_v41 = vld [vmem:[#allocation5 + $0x1c8] sm:$0xff] }
 0x1b8   :  { %v739_v43 = vadd.f32 %v738_v34, %v737_v33  ;;  %v87_v34 = vld [vmem:[#allocation5 + $0x30] sm:$0xff] }
 0x1ba   :  { %v741_v45 = vadd.f32 %v740_v44, %v739_v43  ;;  %v86_v43 = vld [vmem:[#allocation5 + $0x18] sm:$0xff] }
 0x1bb   :  { %v102_v44 = vld [vmem:[#allocation5 + $0x198] sm:$0xff] }
 0x1bc   :  { %v743_v47 = vadd.f32 %v742_v3, %v741_v45  ;;  %v85_v45 = vld [vmem:[#allocation5] sm:$0xff] }
 0x1bd   :  { %v101_v3 = vld [vmem:[#allocation5 + $0x180] sm:$0xff] }
 0x1be   :  { %1433 = vrcp.f32 %v743_v47 }
 0x1bf   :  { %1355 = vmatmul.msk.f32.gmra.mxu0 %vm635_vm15, %v753_v46  ;;  %1371 = vmatmul.msk.f32.gmra.mxu1 %vm635_vm15, %v753_v46  ;;  %v944_v46 = vrot.slane %v1803_v52, 7 }
 0x1c1   :  { %v951_v6 = vsel %vm331_vm4, %v1805_v55, %v944_v46  ;;  %v946_v17 = vsel %vm323_vm1, %v1805_v55, %v944_v46  ;;  %v955_v61 = vsel %vm337_vm6, %v1805_v55, %v944_v46  ;;  %v957_v13 = vsel %vm340_vm7, %v1805_v55, %v944_v46  ;;  %vm1947_vm1 = vmmov %vm1946_vm10 }
 0x1c2   :  { %v952_v53 = vrot.slane %v951_v6, 3  ;;  %v976_v62 = vperm.slane %v946_v17, 0  ;;  %v956_v20 = vrot.slane %v955_v61, 5 }
 0x1c4   :  { %v1434_v48 = vpop.eup %1433  ;;  %v983_v19 = vperm.slane %v952_v53, 1 }
 0x1c5   :  { %v754_v49 = vmul.f32 %v1434_v48, %v1418_v25  ;;  %v755_v50 = vmul.f32 %v1434_v48, %v1420_v26  ;;  %v756_v51 = vmul.f32 %v1434_v48, %v1422_v29  ;;  %v757_v56 = vmul.f32 %v1434_v48, %v1424_v31  ;;  %v92_v29 = vld [vmem:[#allocation5 + $0xa8] sm:$0xff] }
 0x1c6   :  { %v758_v5 = vmul.f32 %v1434_v48, %v1426_v35  ;;  %v759_v11 = vmul.f32 %v1434_v48, %v1428_v38  ;;  %v760_v15 = vmul.f32 %v1434_v48, %v1782_v42  ;;  %v761_v18 = vmul.f32 %v1434_v48, %v1787_v12  ;;  %1109 = vmatpush.msrb.mxu0 %v92_v29  ;;  %v107_v35 = vld [vmem:[#allocation5 + $0x210] sm:$0xff]  ;;  %v89_v38 = vld [vmem:[#allocation5 + $0x60] sm:$0xff] }
 0x1c7   :  { %1356 = vmatmul.msk.f32.gmra.mxu0 %vm635_vm15, %v754_v49  ;;  %1372 = vmatmul.msk.f32.gmra.mxu1 %vm635_vm15, %v754_v49  ;;  %v103_v12 = vld [vmem:[#allocation5 + $0x1b0] sm:$0xff]  ;;  %v947_v49 = vsel %vm325_vm2, %v1805_v55, %v944_v46 }
 0x1c8   :  { %1110 = vmatpush.msrb.mxu0 %v91_v0  ;;  %1133 = vmatpush.msrb.mxu1 %v107_v35  ;;  %v958_v0 = vrot.slane %v957_v13, 6  ;;  %v959_v35 = vsel %vm1947_vm1, %v944_v46, %v1805_v55 }
 0x1ca   :  { %1111 = vmatpush.msrb.mxu0 %v90_v36  ;;  %1134 = vmatpush.msrb.mxu1 %v106_v37 }
 0x1cc   :  { %1112 = vmatpush.msrb.mxu0 %v89_v38  ;;  %1135 = vmatpush.msrb.mxu1 %v105_v39  ;;  %v986_v38 = vperm.slane %v956_v20, 0  ;;  %v987_v39 = vperm.slane %v956_v20, 1 }
 0x1ce   :  { %1113 = vmatpush.msrb.mxu0 %v88_v40  ;;  %1136 = vmatpush.msrb.mxu1 %v104_v41 }
 0x1cf   :  { %1357 = vmatmul.msk.f32.gmra.mxu0 %vm635_vm15, %v755_v50  ;;  %1373 = vmatmul.msk.f32.gmra.mxu1 %vm635_vm15, %v755_v50  ;;  %v949_v50 = vsel %vm328_vm3, %v1805_v55, %v944_v46 }
 0x1d0   :  { %1114 = vmatpush.msrb.mxu0 %v87_v34  ;;  %1137 = vmatpush.msrb.mxu1 %v103_v12  ;;  %v950_v52 = vrot.slane %v949_v50, 2 }
 0x1d2   :  { %1115 = vmatpush.msrb.mxu0 %v86_v43  ;;  %1138 = vmatpush.msrb.mxu1 %v102_v44  ;;  %v980_v57 = vperm.slane %v950_v52, 0  ;;  %v981_v16 = vperm.slane %v950_v52, 1  ;;  %v960_v43 = vrot.slane %v959_v35, 7 }
 0x1d4   :  { %1116 = vmatpush.msrb.mxu0 %v85_v45  ;;  %1139 = vmatpush.msrb.mxu1 %v101_v3  ;;  %v990_v6 = vperm.slane %v960_v43, 0 }
 0x1d7   :  { %1358 = vmatmul.msk.f32.gmra.mxu0 %vm635_vm15, %v756_v51  ;;  %1374 = vmatmul.msk.f32.gmra.mxu1 %vm635_vm15, %v756_v51  ;;  %v948_v51 = vrot.slane %v947_v49, 1 }
 0x1d9   :  { %v978_v58 = vperm.slane %v948_v51, 0  ;;  %v979_v60 = vperm.slane %v948_v51, 1 }
 0x1df   :  { %1359 = vmatmul.msk.f32.gmra.mxu0 %vm635_vm15, %v757_v56  ;;  %1375 = vmatmul.msk.f32.gmra.mxu1 %vm635_vm15, %v757_v56  ;;  %v953_v56 = vsel %vm334_vm5, %v1805_v55, %v944_v46 }
 0x1e7   :  { %1360 = vmatmul.msk.f32.gmra.mxu0 %vm635_vm15, %v758_v5  ;;  %1376 = vmatmul.msk.f32.gmra.mxu1 %vm635_vm15, %v758_v5  ;;  %v977_v5 = vperm.slane %v946_v17, 1  ;;  %v991_v17 = vperm.slane %v960_v43, 1 }
 0x1ef   :  { %1361 = vmatmul.msk.f32.gmra.mxu0 %vm635_vm15, %v759_v11  ;;  %1377 = vmatmul.msk.f32.gmra.mxu1 %vm635_vm15, %v759_v11  ;;  %v954_v11 = vrot.slane %v953_v56, 4 }
 0x1f1   :  { %v984_v29 = vperm.slane %v954_v11, 0  ;;  %v985_v30 = vperm.slane %v954_v11, 1  ;;  %v993_v11 = vperm.slane %v1810_v63, 1 }
 0x1f7   :  { %1362 = vmatmul.msk.f32.gmra.mxu0 %vm635_vm15, %v760_v15  ;;  %1378 = vmatmul.msk.f32.gmra.mxu1 %vm635_vm15, %v760_v15 }
 0x1ff   :  { %1363 = vmatmul.msk.f32.gmra.mxu0 %vm635_vm15, %v761_v18  ;;  %1379 = vmatmul.msk.f32.gmra.mxu1 %vm635_vm15, %v761_v18  ;;  %v982_v18 = vperm.slane %v952_v53, 0 }
 0x204   :  { %v1843_v21 = vpop.f32.mrf.mxu0  ;;  %v1845_v22 = vpop.f32.mrf.mxu1 }
 0x205   :  { %v1040_v59 = vmul.f32 %v976_v62, %v1843_v21  ;;  %v1041_v24 = vmul.f32 %v977_v5, %v1845_v22  ;;  %v963_v62 = vrot.slane %v1813_v1, 1  ;;  %v992_v5 = vperm.slane %v1810_v63, 0 }
 0x207   :  { %v994_v13 = vperm.slane %v963_v62, 0 }
 0x20c   :  { %v1847_v25 = vpop.f32.mrf.mxu0  ;;  %v895_v26 = vpop.f32.mrf.mxu1 }
 0x20d   :  { %v1042_v14 = vmul.f32 %v978_v58, %v1847_v25  ;;  %v1043_v15 = vmul.f32 %v979_v60, %v895_v26 }
 0x20f   :  { %v1072_v36 = vadd.f32 %v1042_v14, %v1040_v59  ;;  %v1079_v25 = vadd.f32 %v1043_v15, %v1041_v24  ;;  %v995_v14 = vperm.slane %v963_v62, 1 }
 0x214   :  { %v833_v31 = vpop.f32.mrf.mxu0  ;;  %v898_v32 = vpop.f32.mrf.mxu1 }
 0x215   :  { %v1044_v27 = vmul.f32 %v980_v57, %v833_v31  ;;  %v1045_v28 = vmul.f32 %v981_v16, %v898_v32  ;;  %v988_v31 = vperm.slane %v958_v0, 0  ;;  %v989_v32 = vperm.slane %v958_v0, 1 }
 0x217   :  { %v1073_v34 = vadd.f32 %v1072_v36, %v1044_v27  ;;  %v1080_v21 = vadd.f32 %v1079_v25, %v1045_v28  ;;  %v965_v27 = vrot.slane %v1816_v2, 2  ;;  %v967_v25 = vrot.slane %v1819_v4, 3 }
 0x218   :  { %v969_v2 = vrot.slane %v1822_v7, 4  ;;  %v971_v4 = vrot.slane %v1827_v8, 5  ;;  %v973_v7 = vrot.slane %v1830_v9, 6  ;;  %v975_v8 = vrot.slane %v1833_v10, 7  ;;  %v1392_v9 = vld [vmem:[%s1943_s4] ss:$0 sm:$0xff] }
 0x219   :  { %v996_v28 = vperm.slane %v965_v27, 0  ;;  %v1445_v10 = vld [vmem:[%s1939_s0] sm:$0xff] }
 0x21c   :  { %v836_v42 = vpop.f32.mrf.mxu0  ;;  %v901_v33 = vpop.f32.mrf.mxu1 }
 0x21d   :  { %v1046_v26 = vmul.f32 %v982_v18, %v836_v42  ;;  %v1047_v37 = vmul.f32 %v983_v19, %v901_v33 }
 0x21f   :  { %v1074_v44 = vadd.f32 %v1073_v34, %v1046_v26  ;;  %v1081_v45 = vadd.f32 %v1080_v21, %v1047_v37  ;;  %v998_v26 = vperm.slane %v967_v25, 0  ;;  %v999_v37 = vperm.slane %v967_v25, 1 }
 0x224   :  { %v839_v47 = vpop.f32.mrf.mxu0  ;;  %v904_v48 = vpop.f32.mrf.mxu1 }
 0x225   :  { %v1048_v12 = vmul.f32 %v984_v29, %v839_v47  ;;  %v1049_v22 = vmul.f32 %v985_v30, %v904_v48  ;;  %v997_v29 = vperm.slane %v965_v27, 1 }
 0x227   :  { %v1075_v55 = vadd.f32 %v1074_v44, %v1048_v12  ;;  %v1082_v46 = vadd.f32 %v1081_v45, %v1049_v22  ;;  %v1000_v12 = vperm.slane %v969_v2, 0  ;;  %v1001_v22 = vperm.slane %v969_v2, 1  ;;  %v81_v2 = vld [vmem:[#allocation2 + $0xc0] sm:$0xff] }
 0x22c   :  { %v842_v23 = vpop.f32.mrf.mxu0  ;;  %v907_v54 = vpop.f32.mrf.mxu1 }
 0x22d   :  { %v1050_v3 = vmul.f32 %v986_v38, %v842_v23  ;;  %v1051_v49 = vmul.f32 %v987_v39, %v907_v54 }
 0x22f   :  { %v1076_v33 = vadd.f32 %v1075_v55, %v1050_v3  ;;  %v1083_v51 = vadd.f32 %v1082_v46, %v1051_v49  ;;  %v1002_v49 = vperm.slane %v971_v4, 0  ;;  %v1003_v55 = vperm.slane %v971_v4, 1 }
 0x234   :  { %v845_v40 = vpop.f32.mrf.mxu0  ;;  %v910_v41 = vpop.f32.mrf.mxu1 }
 0x235   :  { %v1052_v50 = vmul.f32 %v988_v31, %v845_v40  ;;  %v1053_v42 = vmul.f32 %v989_v32, %v910_v41 }
 0x237   :  { %v1077_v53 = vadd.f32 %v1076_v33, %v1052_v50  ;;  %v1084_v47 = vadd.f32 %v1083_v51, %v1053_v42 }
 0x23c   :  { %v848_v52 = vpop.f32.mrf.mxu0  ;;  %v913_v56 = vpop.f32.mrf.mxu1 }
 0x23d   :  { %v1054_v48 = vmul.f32 %v990_v6, %v848_v52  ;;  %v1055_v58 = vmul.f32 %v991_v17, %v913_v56  ;;  %v1004_v17 = vperm.slane %v973_v7, 0  ;;  %v1005_v52 = vperm.slane %v973_v7, 1 }
 0x23f   :  { %v1078_v60 = vadd.f32 %v1077_v53, %v1054_v48  ;;  %v1085_v61 = vadd.f32 %v1084_v47, %v1055_v58 }
 0x241   :  { %1117 = vmatmul.f32.vlgmr.msrb.gmra.mxu0 %v1078_v60  ;;  %1140 = vmatmul.f32.vlgmr.msrb.gmra.mxu1 %v1085_v61  ;;  %v1006_v61 = vperm.slane %v975_v8, 0 }
 0x244   :  { %v851_v23 = vpop.f32.mrf.mxu0  ;;  %v916_v54 = vpop.f32.mrf.mxu1 }
 0x245   :  { %v1056_v16 = vmul.f32 %v992_v5, %v851_v23  ;;  %v1057_v18 = vmul.f32 %v993_v11, %v916_v54  ;;  %v1007_v23 = vperm.slane %v975_v8, 1 }
 0x24c   :  { %v854_v15 = vpop.f32.mrf.mxu0  ;;  %v919_v57 = vpop.f32.mrf.mxu1 }
 0x24d   :  { %v1058_v19 = vmul.f32 %v994_v13, %v854_v15  ;;  %v1059_v20 = vmul.f32 %v995_v14, %v919_v57 }
 0x24f   :  { %v1086_v59 = vadd.f32 %v1058_v19, %v1056_v16  ;;  %v1093_v24 = vadd.f32 %v1059_v20, %v1057_v18 }
 0x254   :  { %v857_v30 = vpop.f32.mrf.mxu0  ;;  %v922_v1 = vpop.f32.mrf.mxu1 }
 0x255   :  { %v1060_v0 = vmul.f32 %v996_v28, %v857_v30  ;;  %v1061_v35 = vmul.f32 %v997_v29, %v922_v1  ;;  %v1446_v29 = vld [vmem:[%s1939_s0 + $0x8] sm:$0xff] }
 0x257   :  { %v1087_v36 = vadd.f32 %v1086_v59, %v1060_v0  ;;  %v1094_v63 = vadd.f32 %v1093_v24, %v1061_v35  ;;  %v1531_v0 = vmov 32.0  }
 0x258   :  { %1435 = vrcp.f32 %v1531_v0  ;;  %v117_v0 = vld [vmem:[#allocation5 + $0x8] sm:$0xff] }
 0x25c   :  { %v860_v38 = vpop.f32.mrf.mxu0  ;;  %v925_v39 = vpop.f32.mrf.mxu1 }
 0x25d   :  { %v1062_v40 = vmul.f32 %v998_v26, %v860_v38  ;;  %v1063_v41 = vmul.f32 %v999_v37, %v925_v39 }
 0x25e   :  { %v1436_v35 = vpop.eup %1435 }
 0x25f   :  { %v1088_v34 = vadd.f32 %v1087_v36, %v1062_v40  ;;  %v1095_v21 = vadd.f32 %v1094_v63, %v1063_v41  ;;  %v1156_v36 = vmul.f32 32.0, %v1436_v35  ;;  %vm1160_vm2 = vweird.f32 %v1436_v35 }
 0x261   :  { %v1157_v63 = vsub.f32 1.0, %v1156_v36 }
 0x263   :  { %v1158_v25 = vmul.f32 %v1436_v35, %v1157_v63 }
 0x264   :  { %v863_v31 = vpop.f32.mrf.mxu0  ;;  %v928_v32 = vpop.f32.mrf.mxu1 }
 0x265   :  { %v1064_v43 = vmul.f32 %v1000_v12, %v863_v31  ;;  %v1065_v44 = vmul.f32 %v1001_v22, %v928_v32  ;;  %v1159_v26 = vadd.f32 %v1436_v35, %v1158_v25 }
 0x267   :  { %v1089_v45 = vadd.f32 %v1088_v34, %v1064_v43  ;;  %v1096_v3 = vadd.f32 %v1095_v21, %v1065_v44  ;;  %v1889_v37 = vsel %vm1160_vm2, %v1436_v35, %v1159_v26  ;;  %v82_v21 = vld [vmem:[#allocation2 + $0x108] sm:$0xff]  ;;  %v80_v44 = vld [vmem:[#allocation2 + $0x78] sm:$0xff]  ;;  %v1395_v35 = vld [vmem:[%s1943_s4 + $0x3] ss:$0 sm:$0xff] }
 0x268   :  { %1225 = vmatpush.msra.mxu2 %v82_v21 }
 0x26a   :  { %1226 = vmatpush.msra.mxu2 %v81_v2 }
 0x26c   :  { %v866_v46 = vpop.f32.mrf.mxu0  ;;  %v931_v50 = vpop.f32.mrf.mxu1  ;;  %1227 = vmatpush.msra.mxu2 %v80_v44 }
 0x26d   :  { %v1066_v42 = vmul.f32 %v1002_v49, %v866_v46  ;;  %v1067_v33 = vmul.f32 %v1003_v55, %v931_v50 }
 0x26f   :  { %v1090_v51 = vadd.f32 %v1089_v45, %v1066_v42  ;;  %v1097_v6 = vadd.f32 %v1096_v3, %v1067_v33  ;;  %v79_v45 = vld [vmem:[#allocation2 + $0x30] sm:$0xff] }
 0x270   :  { %1228 = vmatpush.msra.mxu2 %v79_v45 }
 0x274   :  { %v869_v56 = vpop.f32.mrf.mxu0  ;;  %v934_v53 = vpop.f32.mrf.mxu1 }
 0x275   :  { %v1068_v47 = vmul.f32 %v1004_v17, %v869_v56  ;;  %v1069_v48 = vmul.f32 %v1005_v52, %v934_v53  ;;  %v1394_v52 = vld [vmem:[%s1943_s4 + $0x2] ss:$0 sm:$0xff] }
 0x277   :  { %v1091_v58 = vadd.f32 %v1090_v51, %v1068_v47  ;;  %v1098_v60 = vadd.f32 %v1097_v6, %v1069_v48  ;;  %v1393_v6 = vld [vmem:[%s1943_s4 + $0x1] ss:$0 sm:$0xff]  ;;  %v132_v47 = vld [vmem:[#allocation5 + $0x170] sm:$0xff]  ;;  %v131_v48 = vld [vmem:[#allocation5 + $0x158] sm:$0xff] }
 0x278   :  { %1239 = vmatpush.msra.mxu3 %v132_v47 }
 0x27a   :  { %1240 = vmatpush.msra.mxu3 %v131_v48  ;;  %v1397_v48 = vld [vmem:[%s1943_s4 + $0x5] ss:$0 sm:$0xff] }
 0x27c   :  { %v872_v54 = vpop.f32.mrf.mxu0  ;;  %v937_v62 = vpop.f32.mrf.mxu1 }
 0x27d   :  { %v1070_v5 = vmul.f32 %v1006_v61, %v872_v54  ;;  %v1071_v11 = vmul.f32 %v1007_v23, %v937_v62  ;;  %v129_v61 = vld [vmem:[#allocation5 + $0x128] sm:$0xff]  ;;  %v128_v54 = vld [vmem:[#allocation5 + $0x110] sm:$0xff]  ;;  %v127_v62 = vld [vmem:[#allocation5 + $0xf8] sm:$0xff] }
 0x27f   :  { %v1092_v13 = vadd.f32 %v1091_v58, %v1070_v5  ;;  %v1099_v14 = vadd.f32 %v1098_v60, %v1071_v11  ;;  %v130_v58 = vld [vmem:[#allocation5 + $0x140] sm:$0xff]  ;;  %v125_v11 = vld [vmem:[#allocation5 + $0xc8] sm:$0xff] }
 0x280   :  { %1241 = vmatpush.msra.mxu3 %v130_v58  ;;  %v126_v5 = vld [vmem:[#allocation5 + $0xe0] sm:$0xff] }
 0x281   :  { %1120 = vmatmul.f32.gmra.mxu0 %v1092_v13  ;;  %1143 = vmatmul.f32.gmra.mxu1 %v1099_v14  ;;  %v124_v14 = vld [vmem:[#allocation5 + $0xb0] sm:$0xff] }
 0x282   :  { %1242 = vmatpush.msra.mxu3 %v129_v61 }
 0x284   :  { %1243 = vmatpush.msra.mxu3 %v128_v54 }
 0x286   :  { %1244 = vmatpush.msra.mxu3 %v127_v62 }
 0x288   :  { %1245 = vmatpush.msra.mxu3 %v126_v5 }
 0x28a   :  { %1246 = vmatpush.msra.mxu3 %v125_v11 }
 0x28c   :  { %1247 = vmatpush.msra.mxu3 %v124_v14 }
 0x2be   :  { %v1118_v15 = vpop.f32.mrf.mxu0  ;;  %v1141_v16 = vpop.f32.mrf.mxu1 }
 0x2bf   :  { %v1119_v57 = vadd.f32 %v1392_v9, %v1118_v15  ;;  %v123_v15 = vld [vmem:[#allocation5 + $0x98] sm:$0xff] }
 0x2c0   :  { %1248 = vmatpush.msra.mxu3 %v123_v15 }
 0x2c1   :  { %v1142_v18 = vadd.f32 %v1141_v16, %v1119_v57  ;;  %v122_v16 = vld [vmem:[#allocation5 + $0x80] sm:$0xff] }
 0x2c2   :  { %1249 = vmatpush.msra.mxu3 %v122_v16 }
 0x2c3   :  { %v1147_v19 = vadd.f32 %v1445_v10, %v1142_v18  ;;  %v121_v10 = vld [vmem:[#allocation5 + $0x68] sm:$0xff] }
 0x2c4   :  { %1250 = vmatpush.msra.mxu3 %v121_v10 }
 0x2c5   :  { %v1149_v20 = vsel %vm172_vm0, %v1147_v19, 0.0 }
 0x2c6   :  { %1150 = vadd.xlane.f32.xlu0 %v1149_v20  ;;  %v120_v20 = vld [vmem:[#allocation5 + $0x50] sm:$0xff] }
 0x2c7   :  { %1251 = vmatpush.msra.mxu3 %v120_v20 }
 0x2fe   :  { %v1121_v59 = vpop.f32.mrf.mxu0  ;;  %v1144_v27 = vpop.f32.mrf.mxu1 }
 0x2ff   :  { %v1122_v24 = vadd.f32 %v1392_v9, %v1121_v59 }
 0x301   :  { %v1145_v28 = vadd.f32 %v1144_v27, %v1122_v24 }
 0x303   :  { %v1148_v30 = vadd.f32 %v1446_v29, %v1145_v28 }
 0x305   :  { %v1152_v1 = vsel %vm172_vm0, %v1148_v30, 0.0 }
 0x306   :  { %1153 = vadd.xlane.f32.xlu0 %v1152_v1  ;;  %v118_v1 = vld [vmem:[#allocation5 + $0x20] sm:$0xff] }
 0x339   :  { %v1151_v38 = vpop.xlane.xlu0 %1150 }
 0x33a   :  { %v1162_v39 = vmul.f32 %v1889_v37, %v1151_v38 }
 0x33c   :  { %v1164_v40 = vsub.f32 %v1147_v19, %v1162_v39 }
 0x33e   :  { %v1166_v41 = vmul.f32 %v1164_v40, %v1164_v40 }
 0x340   :  { %v1168_v34 = vsel %vm172_vm0, %v1166_v41, 0.0 }
 0x341   :  { %1169 = vadd.xlane.f32.xlu1 %v1168_v34 }
 0x379   :  { %v1154_v12 = vpop.xlane.xlu0 %1153 }
 0x37a   :  { %v1163_v22 = vmul.f32 %v1889_v37, %v1154_v12 }
 0x37c   :  { %v1894_v31 = vsub.f32 %v1148_v30, %v1163_v22  ;;  %v119_v30 = vld [vmem:[#allocation5 + $0x38] sm:$0xff] }
 0x37d   :  { %1252 = vmatpush.msra.mxu3 %v119_v30 }
 0x37e   :  { %v1167_v32 = vmul.f32 %v1894_v31, %v1894_v31 }
 0x37f   :  { %1253 = vmatpush.msra.mxu3 %v118_v1 }
 0x380   :  { %v1171_v43 = vsel %vm172_vm0, %v1167_v32, 0.0 }
 0x381   :  { %1172 = vadd.xlane.f32.xlu1 %v1171_v43  ;;  %1254 = vmatpush.msra.mxu3 %v117_v0 }
 0x3b4   :  { %v1170_v3 = vpop.xlane.xlu1 %1169 }
 0x3b5   :  { %v1174_v4 = vmul.f32 %v1170_v3, %v1889_v37 }
 0x3b7   :  { %v1176_v49 = vadd.f32 1e-05, %v1174_v4 }
 0x3b9   :  { %1437 = vrsqrt.f32 %v1176_v49  ;;  %vm1184_vm4 = vweird.f32 %v1176_v49 }
 0x3bf   :  { %v1438_v55 = vpop.eup %1437 }
 0x3c0   :  { %v1179_v46 = vmul.f32 %v1438_v55, %v1176_v49  ;;  %vm1185_vm3 = vweird.f32 %v1438_v55 }
 0x3c1   :  { %vm1186_vm5 = vmor %vm1184_vm4, %vm1185_vm3 }
 0x3c2   :  { %v1180_v50 = vmul.f32 %v1438_v55, %v1179_v46 }
 0x3c4   :  { %v1181_v42 = vmul.f32 0.5, %v1180_v50 }
 0x3c6   :  { %v1182_v33 = vsub.f32 1.5, %v1181_v42 }
 0x3c8   :  { %v1183_v51 = vmul.f32 %v1438_v55, %v1182_v33 }
 0x3ca   :  { %v1187_v7 = vsel %vm1186_vm5, %v1438_v55, %v1183_v51 }
 0x3cb   :  { %v1198_v17 = vmul.f32 %v1187_v7, %v1164_v40  ;;  %v1396_v40 = vld [vmem:[%s1943_s4 + $0x4] ss:$0 sm:$0xff] }
 0x3cd   :  { %v1201_v56 = vmul.f32 %v1393_v6, %v1198_v17 }
 0x3cf   :  { %v1906_v53 = vadd.f32 %v1394_v52, %v1201_v56 }
 0x3d1   :  { %1380 = vmatmul.msk.f32.vlgmr.msra.gmra.mxu2 %vm172_vm0, %v1906_v53 }
 0x3f4   :  { %v1173_v60 = vpop.xlane.xlu1 %1172 }
 0x3f5   :  { %v1175_v8 = vmul.f32 %v1173_v60, %v1889_v37  ;;  %v1398_v60 = vld [vmem:[%s1943_s4 + $0x6] ss:$0 sm:$0xff]  ;;  %s1532_s4 = smov [#allocation7]  }
 0x3f6   :  { %s1320_s30 = sshll.u32 %s1532_s4, 4  ;;  %s1321_s30 = int_to_ptr.vmem [resolvable:$true] %s1320_s30 }
 0x3f7   :  { %v1177_v23 = vadd.f32 1e-05, %v1175_v8 }
 0x3f9   :  { %1439 = vrsqrt.f32 %v1177_v23  ;;  %vm1194_vm7 = vweird.f32 %v1177_v23 }
 0x3ff   :  { %v1440_v13 = vpop.eup %1439 }
 0x400   :  { %v1189_v9 = vmul.f32 %v1440_v13, %v1177_v23  ;;  %vm1195_vm6 = vweird.f32 %v1440_v13 }
 0x401   :  { %vm1196_vm15 = vmor %vm1194_vm7, %vm1195_vm6 }
 0x402   :  { %v1190_v57 = vmul.f32 %v1440_v13, %v1189_v9 }
 0x404   :  { %v1191_v18 = vmul.f32 0.5, %v1190_v57 }
 0x406   :  { %v1192_v19 = vsub.f32 1.5, %v1191_v18 }
 0x408   :  { %v1193_v59 = vmul.f32 %v1440_v13, %v1192_v19 }
 0x40a   :  { %v1197_v24 = vsel %vm1196_vm15, %v1440_v13, %v1193_v59 }
 0x40b   :  { %v1199_v27 = vmul.f32 %v1197_v24, %v1894_v31 }
 0x40d   :  { %v1202_v28 = vmul.f32 %v1393_v6, %v1199_v27 }
 0x40f   :  { %v1205_v29 = vadd.f32 %v1394_v52, %v1202_v28 }
 0x411   :  { %1381 = vmatmul.msk.f32.gmra.mxu2 %vm172_vm0, %v1205_v29 }
 0x454   :  { %v1230_v36 = vpop.f32.mrf.mxu2 }
 0x455   :  { %v1231_v63 = vadd.f32 %v1395_v35, %v1230_v36 }
 0x457   :  { %v1236_v25 = vmax.f32 %v1231_v63, 0.0 }
 0x459   :  { %1255 = vmatmul.f32.vlgmr.msra.gmra.mxu3 %v1236_v25 }
 0x494   :  { %v1233_v26 = vpop.f32.mrf.mxu2 }
 0x495   :  { %v1234_v38 = vadd.f32 %v1395_v35, %v1233_v26 }
 0x497   :  { %v1237_v39 = vmax.f32 %v1234_v38, 0.0 }
 0x499   :  { %1258 = vmatmul.f32.gmra.mxu3 %v1237_v39 }
 0x4dc   :  { %v1256_v41 = vpop.f32.mrf.mxu3 }
 0x4dd   :  { %v1257_v34 = vadd.f32 %v1396_v40, %v1256_v41 }
 0x4df   :  { %v1262_v21 = vadd.f32 %v1257_v34, %v1906_v53 }
 0x4e1   :  { %v1264_v2 = vsel %vm172_vm0, %v1262_v21, 0.0 }
 0x4e2   :  { %1265 = vadd.xlane.f32.xlu2 %v1264_v2 }
 0x51c   :  { %v1259_v12 = vpop.f32.mrf.mxu3 }
 0x51d   :  { %v1260_v22 = vadd.f32 %v1396_v40, %v1259_v12 }
 0x51f   :  { %v1263_v31 = vadd.f32 %v1260_v22, %v1205_v29 }
 0x521   :  { %v1267_v32 = vsel %vm172_vm0, %v1263_v31, 0.0 }
 0x522   :  { %1268 = vadd.xlane.f32.xlu2 %v1267_v32 }
 0x555   :  { %v1266_v43 = vpop.xlane.xlu2 %1265 }
 0x556   :  { %v1270_v44 = vmul.f32 %v1266_v43, %v1889_v37 }
 0x558   :  { %v1272_v45 = vsub.f32 %v1262_v21, %v1270_v44 }
 0x55a   :  { %v1274_v3 = vmul.f32 %v1272_v45, %v1272_v45 }
 0x55c   :  { %v1276_v4 = vsel %vm172_vm0, %v1274_v3, 0.0 }
 0x55d   :  { %1277 = vadd.xlane.f32.xlu0 %v1276_v4 }
 0x595   :  { %v1269_v49 = vpop.xlane.xlu2 %1268 }
 0x596   :  { %v1271_v55 = vmul.f32 %v1269_v49, %v1889_v37 }
 0x598   :  { %v1273_v46 = vsub.f32 %v1263_v31, %v1271_v55 }
 0x59a   :  { %v1275_v50 = vmul.f32 %v1273_v46, %v1273_v46 }
 0x59c   :  { %v1279_v42 = vsel %vm172_vm0, %v1275_v50, 0.0 }
 0x59d   :  { %1280 = vadd.xlane.f32.xlu1 %v1279_v42 }
 0x5d0   :  { %v1278_v33 = vpop.xlane.xlu0 %1277 }
 0x5d1   :  { %v1282_v51 = vmul.f32 %v1278_v33, %v1889_v37 }
 0x5d3   :  { %v1284_v6 = vadd.f32 1e-05, %v1282_v51 }
 0x5d5   :  { %1441 = vrsqrt.f32 %v1284_v6  ;;  %vm1292_vm12 = vweird.f32 %v1284_v6 }
 0x5db   :  { %v1442_v7 = vpop.eup %1441 }
 0x5dc   :  { %v1287_v17 = vmul.f32 %v1442_v7, %v1284_v6  ;;  %vm1293_vm11 = vweird.f32 %v1442_v7 }
 0x5dd   :  { %vm1294_vm13 = vmor %vm1292_vm12, %vm1293_vm11 }
 0x5de   :  { %v1288_v52 = vmul.f32 %v1442_v7, %v1287_v17 }
 0x5e0   :  { %v1289_v56 = vmul.f32 0.5, %v1288_v52 }
 0x5e2   :  { %v1290_v53 = vsub.f32 1.5, %v1289_v56 }
 0x5e4   :  { %v1291_v47 = vmul.f32 %v1442_v7, %v1290_v53 }
 0x5e6   :  { %v1295_v58 = vsel %vm1294_vm13, %v1442_v7, %v1291_v47 }
 0x5e7   :  { %v1306_v8 = vmul.f32 %v1295_v58, %v1272_v45 }
 0x5e9   :  { %v1309_v61 = vmul.f32 %v1397_v48, %v1306_v8 }
 0x5eb   :  { %v1312_v23 = vadd.f32 %v1398_v60, %v1309_v61 }
 0x5ed   :  { %1314 = vst.msk [vmem:[#allocation7] sm:$0xff] %vm172_vm0, %v1312_v23 }
 0x610   :  { %v1281_v54 = vpop.xlane.xlu1 %1280 }
 0x611   :  { %v1283_v62 = vmul.f32 %v1281_v54, %v1889_v37 }
 0x613   :  { %v1285_v5 = vadd.f32 1e-05, %v1283_v62 }
 0x615   :  { %1443 = vrsqrt.f32 %v1285_v5  ;;  %vm1302_vm9 = vweird.f32 %v1285_v5 }
 0x61b   :  { %v1444_v11 = vpop.eup %1443 }
 0x61c   :  { %v1297_v13 = vmul.f32 %v1444_v11, %v1285_v5  ;;  %vm1303_vm14 = vweird.f32 %v1444_v11 }
 0x61d   :  { %vm1304_vm8 = vmor %vm1302_vm9, %vm1303_vm14 }
 0x61e   :  { %v1298_v14 = vmul.f32 %v1444_v11, %v1297_v13 }
 0x620   :  { %v1299_v9 = vmul.f32 0.5, %v1298_v14 }
 0x622   :  { %v1300_v15 = vsub.f32 1.5, %v1299_v9 }
 0x624   :  { %v1301_v57 = vmul.f32 %v1444_v11, %v1300_v15 }
 0x626   :  { %v1305_v16 = vsel %vm1304_vm8, %v1444_v11, %v1301_v57 }
 0x627   :  { %v1307_v18 = vmul.f32 %v1305_v16, %v1273_v46 }
 0x629   :  { %v1310_v37 = vmul.f32 %v1397_v48, %v1307_v18 }
 0x62b   :  { %v1313_v10 = vadd.f32 %v1398_v60, %v1310_v37 }
 0x62d   :  { %1315 = vst.msk [vmem:[#allocation7 + $0x8] sm:$0xff] %vm172_vm0, %v1313_v10 }
 0x62e   :  { %1328 = dma.vmem_to_hbm [thread:$0]  %s1321_s30, 256, %s1323_s3, [#allocation4], %s1533_s7, %s1533_s7, %s1534_s8  }
 0x62f   :  { %1523 = dma.done.wait [#allocation4], 256  }
 0x630   :  { %1524 = vsyncadd [#allocation4], 4294967040 }
 0x631   :  { %1333 = vsyncpa [#allocation3], 1 }
 0x632   :  { %1334 = vsyncpa [#allocation6], 1 }
 0x633   :  { %1335 = vsyncpa [#allocation4], 1 }

</bundles_post_ra>
